<compile_context>
chip_gen: v6e
topology: v6e:2x2x1
jax: 0.10.0
libtpu: 0.0.40
codegen_flags: <defaults>
</compile_context>

<pallas_src>
import functools
import math

import jax
import jax.numpy as jnp
from jax.experimental import pallas as pl
from jax.experimental.pallas import tpu as pltpu


def _pos_embed_kernel(y_ref, x_ref, out_ref, *, num_pos_feats, temperature):
    # y_ref, x_ref: (1, HW) f32 cumsum embeddings (already normalized if requested)
    # out_ref:      (Ct, HW) f32 — one channel tile of the NC(HW) output
    F = num_pos_feats
    Ct = out_ref.shape[0]

    log_t_over_f = jnp.float32(-math.log(temperature) / F)
    half_pi = jnp.float32(math.pi / 2.0)

    if Ct == 2 * F:
        # Fallback: single full-channel block per batch element (used when F % 8 != 0).
        c_idx = jax.lax.broadcasted_iota(jnp.int32, (Ct, 1), 0)
        in_y = c_idx < F
        f_idx = jnp.where(in_y, c_idx, c_idx - F)                  # (Ct, 1)
        embed = jnp.where(in_y, y_ref[...], x_ref[...])            # (Ct, HW) via broadcast
    else:
        # Tiled path: each channel tile lies entirely in pos_y ([0:F)) or pos_x ([F:2F)).
        t = pl.program_id(1)
        c0 = t * Ct
        use_y = c0 < F
        embed = jnp.where(use_y, y_ref[...], x_ref[...])           # (1, HW)
        f_idx = (c0 % F) + jax.lax.broadcasted_iota(jnp.int32, (Ct, 1), 0)

    # Tiny per-tile tables: Ct exps vs. Ct*HW sins -> negligible.
    parity = f_idx & 1                                             # (Ct, 1) int32
    expo2 = (f_idx - parity).astype(jnp.float32)                   # 2 * (f // 2)
    inv_dim_t = jnp.exp(expo2 * log_t_over_f)                      # T ** (-2*(f//2)/F)
    phase = parity.astype(jnp.float32) * half_pi                   # even -> sin, odd -> cos

    out_ref[...] = jnp.sin(embed * inv_dim_t + phase)              # (Ct, HW)


def position_embedding_sine(mask, *, num_pos_feats=64, temperature=10000,
                            normalize=False, scale=None):
    """Pallas implementation of PositionEmbeddingSine.forward.

    mask: (B, H, W) bool (True = padded).  Returns (B, 2*num_pos_feats, H, W) f32.
    """
    if scale is not None and normalize is False:
        raise ValueError("normalize should be True if scale is passed")
    if scale is None:
        scale = 2 * math.pi

    B, H, W = mask.shape
    F = int(num_pos_feats)
    C = 2 * F
    HW = H * W

    # Cheap O(B*H*W) prologue (cumsum + optional normalize) done in the wrapper —
    # keeps the kernel a pure broadcast + sin body.
    not_mask = (~mask).astype(jnp.float32)
    y_embed = jnp.cumsum(not_mask, axis=1)
    x_embed = jnp.cumsum(not_mask, axis=2)
    if normalize:
        eps = 1e-6
        y_embed = (y_embed - 0.5) / (y_embed[:, -1:, :] + eps) * scale
        x_embed = (x_embed - 0.5) / (x_embed[:, :, -1:] + eps) * scale

    y_flat = y_embed.reshape(B, 1, HW)
    x_flat = x_embed.reshape(B, 1, HW)

    # Channel tile: multiple of 8, divides F (so a tile never straddles the y/x
    # boundary), shrunk until a double-buffered output block fits scoped VMEM.
    if F % 8 == 0:
        ct = F
        while ct % 16 == 0 and ct * HW * 4 > (8 << 20):
            ct //= 2
    else:
        ct = C  # single full-channel block; kernel handles both halves internally
    n_ct = C // ct

    kernel = functools.partial(
        _pos_embed_kernel, num_pos_feats=F, temperature=float(temperature))

    # 2 output buffers + 2x2 tiny input buffers + slack.
    vmem_est = 2 * (ct * HW * 4) + 4 * (HW * 4) + (2 << 20)
    vmem_limit = int(min(max(vmem_est, 24 << 20), 60 << 20))

    cost = pl.CostEstimate(
        flops=3 * B * C * HW,              # mul + add + select per output element
        transcendentals=B * C * HW,        # one sin per output element
        bytes_accessed=4 * (B * C * HW + 2 * B * HW),
    )

    out_flat = pl.pallas_call(
        kernel,
        out_shape=jax.ShapeDtypeStruct((B, C, HW), jnp.float32),
        grid_spec=pltpu.PrefetchScalarGridSpec(
            num_scalar_prefetch=0,
            grid=(B, n_ct),
            in_specs=[
                pl.BlockSpec((None, 1, HW), lambda b, t: (b, 0, 0)),
                pl.BlockSpec((None, 1, HW), lambda b, t: (b, 0, 0)),
            ],
            out_specs=pl.BlockSpec((None, ct, HW), lambda b, t: (b, t, 0)),
        ),
        compiler_params=pltpu.CompilerParams(
            dimension_semantics=("parallel", "parallel"),
            vmem_limit_bytes=vmem_limit,
        ),
        cost_estimate=cost,
    )(y_flat, x_flat)

    return out_flat.reshape(B, C, H, W)


def _reference(mask, *, num_pos_feats, temperature, normalize, scale):
    """Pure-JAX transliteration of the PyTorch forward for correctness checking."""
    not_mask = (~mask).astype(jnp.float32)
    y_embed = jnp.cumsum(not_mask, axis=1)
    x_embed = jnp.cumsum(not_mask, axis=2)
    if normalize:
        eps = 1e-6
        y_embed = (y_embed - 0.5) / (y_embed[:, -1:, :] + eps) * scale
        x_embed = (x_embed - 0.5) / (x_embed[:, :, -1:] + eps) * scale
    dim_t = jnp.arange(num_pos_feats, dtype=jnp.float32)
    dim_t = temperature ** (2 * jnp.floor(dim_t / 2) / num_pos_feats)
    pos_x = x_embed[:, :, :, None] / dim_t
    pos_y = y_embed[:, :, :, None] / dim_t
    B, H, W = mask.shape
    pos_x = jnp.stack((jnp.sin(pos_x[..., 0::2]), jnp.cos(pos_x[..., 1::2])),
                      axis=4).reshape(B, H, W, num_pos_feats)
    pos_y = jnp.stack((jnp.sin(pos_y[..., 0::2]), jnp.cos(pos_y[..., 1::2])),
                      axis=4).reshape(B, H, W, num_pos_feats)
    return jnp.concatenate((pos_y, pos_x), axis=3).transpose(0, 3, 1, 2)


if __name__ == "__main__":
    # Small shapes consistent with the module: batch=2, channels=4, spatial=16,
    # num_pos_feats=32 -> output (2, 64, 16, 16).
    B, Cin, H, W = 2, 4, 16, 16
    num_pos_feats = 32

    key = jax.random.PRNGKey(0)
    x = jax.random.normal(key, (B, Cin, H, W), jnp.float32)  # unused by the math, as in PyTorch

    # Deterministic DETR-style rectangular padding masks (True == padded).
    valid_h = jnp.array([16, 11], dtype=jnp.int32)
    valid_w = jnp.array([14, 16], dtype=jnp.int32)
    hh = jnp.arange(H)[None, :, None]
    ww = jnp.arange(W)[None, None, :]
    padded_mask = (hh >= valid_h[:, None, None]) | (ww >= valid_w[:, None, None])
    empty_mask = jnp.zeros((B, H, W), dtype=bool)  # no padding (for the normalize path)

    cases = [
        dict(mask=padded_mask, normalize=False, scale=None),
        dict(mask=empty_mask, normalize=True, scale=2 * math.pi),
    ]
    for case in cases:
        m = case["mask"]
        pos = position_embedding_sine(m, num_pos_feats=num_pos_feats, temperature=10000,
                                      normalize=case["normalize"], scale=case["scale"])
        pos = jax.block_until_ready(pos)
        ref_scale = case["scale"] if case["scale"] is not None else 2 * math.pi
        ref = _reference(m, num_pos_feats=num_pos_feats, temperature=10000,
                         normalize=case["normalize"], scale=ref_scale)
        assert pos.shape == (B, 2 * num_pos_feats, H, W), pos.shape
        assert pos.dtype == jnp.float32
        assert bool(jnp.all(jnp.isfinite(pos)))
        assert bool(jnp.allclose(pos, ref, atol=1e-4, rtol=1e-4)), "mismatch vs reference"

    print("KERNEL_OK")
</pallas_src>

<mosaic_0001>
module attributes {stable_mosaic.version = 11 : i64} {
  func.func @_pos_embed_kernel(%arg0: i32, %arg1: i32, %arg2: memref<1x1x256xf32, #tpu.memory_space<vmem>>, %arg3: memref<1x1x256xf32, #tpu.memory_space<vmem>>, %arg4: memref<1x32x256xf32, #tpu.memory_space<vmem>>) attributes {dimension_semantics = [#tpu.dimension_semantics<parallel>, #tpu.dimension_semantics<parallel>], iteration_bounds = array<i64: 2, 2>, scalar_prefetch = 0 : i64, scratch_operands = 0 : i64, tpu.core_type = #tpu.core_type<tc>, window_params = [{transform_indices = @transform_0, window_bounds = array<i64: 1, 1, 256>}, {transform_indices = @transform_1, window_bounds = array<i64: 1, 1, 256>}, {transform_indices = @transform_2, window_bounds = array<i64: 1, 32, 256>}]} {
    %c32_i32 = arith.constant 32 : i32
    %0 = arith.muli %arg1, %c32_i32 : i32
    %c32_i32_0 = arith.constant 32 : i32
    %1 = arith.cmpi slt, %0, %c32_i32_0 : i32
    %c0 = arith.constant 0 : index
    %c0_1 = arith.constant 0 : index
    %c0_2 = arith.constant 0 : index
    %2 = vector.load %arg2[%c0, %c0_1, %c0_2] : memref<1x1x256xf32, #tpu.memory_space<vmem>>, vector<1x1x256xf32>
    %3 = vector.shape_cast %2 : vector<1x1x256xf32> to vector<1x256xf32>
    %c0_3 = arith.constant 0 : index
    %c0_4 = arith.constant 0 : index
    %c0_5 = arith.constant 0 : index
    %4 = vector.load %arg3[%c0_3, %c0_4, %c0_5] : memref<1x1x256xf32, #tpu.memory_space<vmem>>, vector<1x1x256xf32>
    %5 = vector.shape_cast %4 : vector<1x1x256xf32> to vector<1x256xf32>
    %6 = arith.select %1, %3, %5 : vector<1x256xf32>
    %c32_i32_6 = arith.constant 32 : i32
    %c0_i32 = arith.constant 0 : i32
    %7 = arith.cmpi eq, %c32_i32_6, %c0_i32 : i32
    %c1_i32 = arith.constant 1 : i32
    %8 = arith.select %7, %c1_i32, %c32_i32_6 : i32
    %9 = arith.remsi %0, %8 : i32
    %c0_i32_7 = arith.constant 0 : i32
    %10 = arith.cmpi ne, %9, %c0_i32_7 : i32
    %c0_i32_8 = arith.constant 0 : i32
    %11 = arith.cmpi slt, %9, %c0_i32_8 : i32
    %c0_i32_9 = arith.constant 0 : i32
    %12 = arith.cmpi slt, %8, %c0_i32_9 : i32
    %13 = arith.xori %11, %12 : i1
    %14 = arith.andi %13, %10 : i1
    %15 = arith.addi %9, %8 : i32
    %16 = arith.select %14, %15, %9 : i32
    %17 = tpu.iota {dimensions = array<i32: 0>} : vector<32x1xi32>
    %18 = vector.broadcast %16 : i32 to vector<32x1xi32>
    %19 = arith.addi %18, %17 : vector<32x1xi32>
    %c1_i32_10 = arith.constant 1 : i32
    %20 = vector.broadcast %c1_i32_10 : i32 to vector<32x1xi32>
    %21 = arith.andi %19, %20 : vector<32x1xi32>
    %22 = arith.subi %19, %21 : vector<32x1xi32>
    %23 = arith.sitofp %22 : vector<32x1xi32> to vector<32x1xf32>
    %cst = arith.constant -0.287823141 : f32
    %24 = vector.broadcast %cst : f32 to vector<32x1xf32>
    %25 = arith.mulf %23, %24 : vector<32x1xf32>
    %26 = math.exp %25 : vector<32x1xf32>
    %27 = arith.sitofp %21 : vector<32x1xi32> to vector<32x1xf32>
    %cst_11 = arith.constant 1.57079637 : f32
    %28 = vector.broadcast %cst_11 : f32 to vector<32x1xf32>
    %29 = arith.mulf %27, %28 : vector<32x1xf32>
    %30 = vector.broadcast %6 : vector<1x256xf32> to vector<32x256xf32>
    %31 = vector.broadcast %26 : vector<32x1xf32> to vector<32x256xf32>
    %32 = arith.mulf %30, %31 : vector<32x256xf32>
    %33 = vector.broadcast %29 : vector<32x1xf32> to vector<32x256xf32>
    %34 = arith.addf %32, %33 : vector<32x256xf32>
    %35 = math.sin %34 : vector<32x256xf32>
    %c0_12 = arith.constant 0 : index
    %c0_13 = arith.constant 0 : index
    %c0_14 = arith.constant 0 : index
    %36 = vector.load %arg4[%c0_12, %c0_13, %c0_14] : memref<1x32x256xf32, #tpu.memory_space<vmem>>, vector<1x32x256xf32>
    %37 = vector.shape_cast %36 : vector<1x32x256xf32> to vector<32x256xf32>
    %38 = vector.shape_cast %35 : vector<32x256xf32> to vector<1x32x256xf32>
    tpu.vector_store %arg4[%c0_12, %c0_13, %c0_14], %38 {strides = array<i32>} : memref<1x32x256xf32, #tpu.memory_space<vmem>>, vector<1x32x256xf32>,
    return
  }
  func.func @transform_0(%arg0: i32, %arg1: i32) -> (i32, i32, i32) {
    %c0_i32 = arith.constant 0 : i32
    %c0_i32_0 = arith.constant 0 : i32
    %c0_i32_1 = arith.constant 0 : i32
    return %arg0, %c0_i32, %c0_i32_0 : i32, i32, i32
  }
  func.func @transform_1(%arg0: i32, %arg1: i32) -> (i32, i32, i32) {
    %c0_i32 = arith.constant 0 : i32
    %c0_i32_0 = arith.constant 0 : i32
    %c0_i32_1 = arith.constant 0 : i32
    return %arg0, %c0_i32, %c0_i32_0 : i32, i32, i32
  }
  func.func @transform_2(%arg0: i32, %arg1: i32) -> (i32, i32, i32) {
    %c0_i32 = arith.constant 0 : i32
    %c0_i32_0 = arith.constant 0 : i32
    return %arg0, %arg1, %c0_i32 : i32, i32, i32
  }
}

</mosaic_0001>

<bundles_post_ra>
// kernel: tpu_custom_call.1
= control target key start
LH: loop header
LB: loop body
LE: loop exit
PB: predicated region body
PF: predicated region fallthrough
CT: control target
= control target key end

     0   :  { %s2539_s0 = inlined_call_operand.hbm [shape: f32[2,1,256], index: 0, kind: input, shape index: {}]   ;;  %s2540_s1 = inlined_call_operand.hbm [shape: f32[2,1,256], index: 1, kind: input, shape index: {}]   ;;  %s2541_s2 = inlined_call_operand.hbm [shape: f32[2,64,256], index: 2, kind: output, shape index: {}]  }
   0x1   :  { %2545 = sst [smem:[#allocation14_spill]] %s2539_s0 }
   0x2   :  { %7 = vsyncpa [#allocation3], 0 }
   0x3   :  { %9 = vsyncpa [#allocation3 + $0x1], 0 }
   0x4   :  { %10 = vsyncpa [#allocation6], 0 }
   0x5   :  { %12 = vsyncpa [#allocation6 + $0x1], 0 }
   0x6   :  { %13 = vsyncpa [#allocation4], 0 }
   0x7   :  { %15 = vsyncpa [#allocation4 + $0x1], 0  ;;  %s1724_s9 = smov 0   ;;  %s1726_s10 = smov 0  }
   0x8   :  { %s1728_s11 = smov 0   ;;  %s1730_s12 = smov 0  }
   0x9   :  { %s1732_s13 = smov 0   ;;  %s1734_s14 = smov 0  }
   0xa   :  { %s1736_s15 = smov 0   ;;  %s1738_s16 = smov 0  }
   0xb   :  { %s1740_s17 = smov 0   ;;  %s1742_s18 = smov 0  }
   0xc   :  { %s1744_s19 = smov 0  }
   0xd LB: > { %2546 = sst [smem:[#allocation11_spill]] %s1692_s18  ;;  %s1269_s20 = sadd.s32 4294967295, %s1696_s19   ;;  %s1696_s19 = sphi %s1744_s19, %s21_s19   ;;  %s1692_s18 = sphi %s1742_s18, %s2570_s18   ;;  %s1688_s17 = sphi %s1740_s17, %s2578_s17   ;;  %s1684_s16 = sphi %s1738_s16, %s2568_s16   ;;  %s1680_s15 = sphi %s1736_s15, %s2577_s15   ;;  %s1676_s14 = sphi %s1734_s14, %s2576_s14   ;;  %s1672_s13 = sphi %s1732_s13, %s2575_s13   ;;  %s1668_s12 = sphi %s1730_s12, %s2574_s12   ;;  %s1664_s11 = sphi %s1728_s11, %s2573_s11   ;;  %s1660_s10 = sphi %s1726_s10, %s2572_s10   ;;  %s1656_s9 = sphi %s1724_s9, %s2571_s9  }
   0xe   : > { %s1270_s21 = sadd.s32 4294967294, %s1696_s19   ;;  %s30_s22 = sadd.s32 1, %s1688_s17 }
   0xf   : > { %s33_s23 = sadd.s32 1, %s1692_s18  ;;  %p31_p0 = scmp.ge.s32.totalorder %s30_s22, 2 }
  0x10   : > { %s40_s24 = sadd.s32 1, %s1676_s14  ;;  %p47_p1 = scmp.ne.s32.totalorder %s1676_s14, %s1672_s13 }
  0x11   : > { %p48_p2 = scmp.eq.s32.totalorder %s1696_s19, 0  ;;  %s2580_s22 = smov (%p31_p0, %s30_s22), 0 }
  0x12   : > { %2547 = sst [smem:[#allocation12_spill]] %s2580_s22  ;;  %s2582_s23 = smov (!%p31_p0, %s33_s23), %s1692_s18 }
  0x13   : > { %p1788_p3 = por %p48_p2, %p47_p1  ;;  %p53_p4 = scmp.ne.s32.totalorder %s1672_s13, %s1668_s12 }
  0x14   : > { %p35_p5 = scmp.ge.s32.totalorder %s2582_s23, 2  ;;  %p54_p6 = scmp.eq.s32.totalorder %s1269_s20, 0 }
  0x15   : > { %s90_s26 = ssub.s32 %s1688_s17, %s2580_s22  ;;  %s94_s27 = sadd.s32 1, %s1664_s11 }
  0x16   : > { %s2584_s23 = smov (%p35_p5, %s2582_s23), 0  ;;  %p1798_p7 = por %p54_p6, %p53_p4 }
  0x17   : > { %2549 = sst [smem:[#allocation13_spill]] %s2584_s23  ;;  %p104_p8 = scmp.ne.s32.totalorder %s1664_s11, %s1660_s10 }
  0x18   : > { %s37_s29 = ssub.s32 %s1692_s18, %s2584_s23  ;;  %p105_p9 = scmp.eq.s32.totalorder %s1269_s20, 3 }
  0x19   : > { %p38_p10 = scmp.eq.s32.totalorder %s37_s29, 0  ;;  %s91_s30 = sor.u32 %s90_s26, %s37_s29 }
  0x1a   : > { %p92_p11 = scmp.eq.s32.totalorder %s91_s30, 0  ;;  %p1806_p12 = por %p105_p9, %p104_p8 }
  0x1b   : > { %s1811_s4 = scalar_select %p38_p10, %s1676_s14, %s40_s24  }
  0x1c   : > { %s1814_s5 = scalar_select %p92_p11, %s1664_s11, %s94_s27  }
  0x1d   : > { %p110_p13 = scmp.ne.s32.totalorder %s1660_s10, %s1656_s9  ;;  %p111_p0 = scmp.eq.s32.totalorder %s1270_s21, 3 }
  0x1e   : > { %p1378_p1 = scmp.lt.s32.totalorder %s1696_s19, 4  ;;  %s1824_s7 = sand.u32 1, %s1676_s14  }
  0x1f   : > { %p1819_p2 = por %p111_p0, %p110_p13  ;;  %s1273_s8 = sshll.u32 %s1824_s7, 1 }
  0x20   : > { %s1326_s12 = sshll.u32 %s1692_s18, 5  ;;  %s2553_s0 = sld [smem:[#allocation14_spill]] }
  0x21   : > { %s135_s29 = scalar_lea.vmem [#allocation2], %s1273_s8  ;;  %p1833_p4 = pnand %p1378_p1, %p1788_p3 }
  0x22   : > { %s143_s27 = sshll.u32 %s135_s29, 4  ;;  %p1279_p5 = scmp.ge.s32.totalorder %s1696_s19, 1  ;;  %s144_s27 = int_to_ptr.vmem [resolvable:$true] %s143_s27 }
  0x23   : > { %p167_p6 = scmp.lt.s32.totalorder %s1696_s19, 5  ;;  %s132_s30 = scalar_lea.sflag [#allocation3], %s1824_s7 }
  0x24   : > { %p1518_p8 = pneg %p1833_p4  ;;  %s1529_s23 = scalar_lea.vmem %s144_s27, 32 }
  0x25   : > { %p1530_p9 = scmp.ne.s32.totalorder %s144_s27, %s1529_s23  ;;  %s1698_s20 = smov [#allocation2]  }
  0x26   : > { %s141_s24 = scalar_lea.hbm %s2553_s0, %s1326_s12  ;;  %s1534_s26 = sshll.u32 %s1698_s20, 4  ;;  %s1535_s26 = int_to_ptr.vmem [resolvable:$false] %s1534_s26 }
  0x27   : > { %p1532_p10 = pnand %p1530_p9, %p1518_p8  ;;  %s1536_s25 = scalar_lea.vmem %s1535_s26, 64 }
  0x28   : > { %p1537_p3 = scmp.lt.s32.totalorder %s144_s27, %s1535_s26  ;;  %p1538_p13 = scmp.lt.s32.totalorder %s1536_s25, %s1529_s23 }
  0x29   : > { %p1533_p11 = pneg %p1532_p10 }
  0x2a   : > { %p1539_p0 = por %p1538_p13, %p1537_p3 }
  0x2c   : > { %p1540_p1 = pnand %p1539_p0, %p1533_p11 }
  0x2e   : > { %1543 = shalt.err (!%p1540_p1)
}
  0x2f   : > { %1370 = dma.hbm_to_vmem [thread:$0]  (!%p1833_p4), %s141_s24, 32, %s144_s27, %s132_s30  }
  0x30   : > { %p1851_p9 = pnand %p1279_p5, %p167_p6  ;;  %s160_s23 = scalar_lea.hbm %s2540_s1, %s1326_s12 }
  0x31   : > { %s154_s26 = scalar_lea.vmem [#allocation5], %s1273_s8  ;;  %s151_s22 = scalar_lea.sflag [#allocation6], %s1824_s7 }
  0x32   : > { %s162_s25 = sshll.u32 %s154_s26, 4  ;;  %s1699_s24 = smov [#allocation5]   ;;  %s163_s25 = int_to_ptr.vmem [resolvable:$true] %s162_s25 }
  0x33   : > { %s1557_s18 = scalar_lea.vmem %s163_s25, 32  ;;  %s1562_s27 = sshll.u32 %s1699_s24, 4  ;;  %s1563_s27 = int_to_ptr.vmem [resolvable:$false] %s1562_s27 }
  0x34   : > { %p1558_p10 = scmp.ne.s32.totalorder %s163_s25, %s1557_s18  ;;  %s1564_s30 = scalar_lea.vmem %s1563_s27, 64 }
  0x35   : > { %p1565_p5 = scmp.lt.s32.totalorder %s163_s25, %s1563_s27  ;;  %p1566_p6 = scmp.lt.s32.totalorder %s1564_s30, %s1557_s18 }
  0x36   : > { %p1560_p11 = pnand %p1558_p10, %p1518_p8 }
  0x37   : > { %p1567_p13 = por %p1566_p6, %p1565_p5 }
  0x38   : > { %p1561_p3 = pneg %p1560_p11 }
  0x3a   : > { %p1568_p0 = pnand %p1567_p13, %p1561_p3 }
  0x3c   : > { %1571 = shalt.err (!%p1568_p0)
}
  0x3d   : > { %1373 = dma.hbm_to_vmem [thread:$0]  (!%p1833_p4), %s160_s23, 32, %s163_s25, %s151_s22  }
  0x3e   : > { %171 = sbr.rel (%p1851_p9) target bundleno = 360 (0x168), region = 28  ;;  %s173_s0 = sand.u32 (!%p1851_p9), 1, %s1672_s13  }
  0x3f   : > { %s1280_s7 = sshll.u32 (!%p1851_p9), %s173_s0, 1  ;;  %s174_s8 = scalar_lea.sflag (!%p1851_p9), [#allocation3], %s173_s0 }
  0x40   : > { %s1867_s12 = scalar_lea.vmem (!%p1851_p9), [#allocation2], %s1280_s7 }
  0x43   : > { %1643 = dma.done.wait (%p1798_p7), %s174_s8, 32  }
  0x44   : > { %1645 = vsyncadd (%p1798_p7), %s174_s8, 4294967264  ;;  %s183_s18 = scalar_lea.sflag [#allocation6], %s173_s0  ;;  %s1873_s20 = scalar_lea.vmem [#allocation5], %s1280_s7 }
  0x45   : > { %1647 = dma.done.wait (%p1798_p7), %s183_s18, 32  }
  0x46   : > { %1649 = vsyncadd (%p1798_p7), %s183_s18, 4294967264  ;;  %s1880_s22 = sshll.u32 %s1680_s15, 5  ;;  %v233_v0 = vlaneseq  ;;  %v215_v31 = vld [vmem:[%s1867_s12] sm:$0x3]  ;;  %v216_v32 = vld [vmem:[%s1873_s20] sm:$0x3] }
  0x47   : > { %p221_p4 = scmp.lt.s32.totalorder %s1880_s22, 0  ;;  %s222_s21 = ssub.s32 0, %s1880_s22 }
  0x48   : > { %s1284_s29 = smin.u32 %s1880_s22, %s222_s21  ;;  %v234_v1 = vshrl.u32 %v233_v0, 7  ;;  %p214_p7 = scmp.lt.s32.totalorder %s1880_s22, 32 }
  0x49   : > { %s224_s23 = sand.u32 31, %s1284_s29   ;;  %s209_s24 = sand.u32 1, %s1660_s10  }
  0x4a   : > { %s225_s26 = ssub.s32 0, %s224_s23  ;;  %v235_v2 = vadd.s32 8, %v234_v1  ;;  %v236_v3 = vadd.s32 16, %v234_v1  ;;  %v237_v4 = vadd.s32 24, %v234_v1  ;;  %v278_v33 = vsub.s32 0, %v234_v1  ;;  %s1282_s27 = sshll.u32 %s209_s24, 6 }
  0x4b   : > { %s2586_s26 = smov (!%p221_p4, %s225_s26), %s224_s23  ;;  %v282_v34 = vsub.s32 1, %v234_v1  ;;  %s2193_s30 = scalar_lea.vmem [#allocation7], %s1282_s27 }
  0x4c   : > { %p1286_p8 = scmp.lt.s32.totalorder %s2586_s26, 0  ;;  %s231_s25 = sadd.s32 32, %s2586_s26 }
  0x4d   : > { %s217_s28 = scalar_select %p214_p7, 1, 0 }
  0x4e   : > { %s2588_s25 = smov (!%p1286_p8, %s231_s25), %s2586_s26  ;;  %s1328_s0 = sshll.u32 %s1680_s15, 3 }
  0x4f   : > { %v238_v5 = vstv %s2588_s25  ;;  %v218_v30 = vstv %s217_s28  ;;  %s1322_s7 = sshll.u32 %s1684_s16, 4  ;;  %s1159_s18 = sshll.u32 %s2193_s30, 4  ;;  %s2474_s18 = int_to_ptr.vmem [resolvable:$true] %s1159_s18 }
  0x50   : > { %v239_v6 = vadd.s32 %v238_v5, %v234_v1  ;;  %v240_v7 = vadd.s32 %v238_v5, %v235_v2  ;;  %v241_v8 = vadd.s32 %v238_v5, %v236_v3  ;;  %v242_v9 = vadd.s32 %v238_v5, %v237_v4  ;;  %s1156_s8 = sadd.s32 %s1328_s0, %s1322_s7  ;;  %s2479_s22 = scalar_lea.sflag [#allocation4], %s209_s24 }
  0x51   : > { %vm219_vm0 = vcmp.eq.s32.totalorder %v218_v30, 1  ;;  %s1323_s12 = sshll.u32 %s1156_s8, 7  ;;  %s1572_s21 = scalar_lea.vmem %s2474_s18, 1024 }
  0x52   : > { %v243_v10 = vand.u32 1, %v239_v6  ;;  %v244_v11 = vand.u32 1, %v240_v7  ;;  %v245_v12 = vand.u32 1, %v241_v8  ;;  %v246_v13 = vand.u32 1, %v242_v9  ;;  %s2472_s20 = scalar_lea.hbm %s2541_s2, %s1323_s12  ;;  %p1573_p1 = scmp.ne.s32.totalorder %s2474_s18, %s1572_s21 }
  0x53   : > { %v220_v35 = vsel %vm219_vm0, %v215_v31, %v216_v32  ;;  %v1702_v31 = vmov 2131351028   ;;  %s1706_s29 = smov [#allocation7]  }
  0x54   : > { %v247_v14 = vsub.s32 %v239_v6, %v243_v10  ;;  %v248_v15 = vsub.s32 %v240_v7, %v244_v11  ;;  %v249_v16 = vsub.s32 %v241_v8, %v245_v12  ;;  %v250_v17 = vsub.s32 %v242_v9, %v246_v13  ;;  %p1574_p9 = pnand %p1573_p1, %p1806_p12  ;;  %s1576_s23 = sshll.u32 %s1706_s29, 4  ;;  %s1577_s23 = int_to_ptr.vmem [resolvable:$false] %s1576_s23 }
  0x55   : > { %v267_v36 = vcvt.s32.f32 %v243_v10  ;;  %v269_v37 = vcvt.s32.f32 %v245_v12  ;;  %v279_v38 = vrot.slane %v220_v35, %v278_v33  ;;  %v283_v39 = vrot.slane %v220_v35, %v282_v34  ;;  %s1578_s26 = scalar_lea.vmem %s1577_s23, 2048  ;;  %p1579_p11 = scmp.lt.s32.totalorder %s2474_s18, %s1577_s23 }
  0x56   : > { %v251_v18 = vcvt.s32.f32 %v247_v14  ;;  %v252_v19 = vcvt.s32.f32 %v248_v15  ;;  %v253_v20 = vcvt.s32.f32 %v249_v16  ;;  %v254_v21 = vcvt.s32.f32 %v250_v17  ;;  %p1575_p10 = pneg %p1574_p9  ;;  %p1580_p3 = scmp.lt.s32.totalorder %s1578_s26, %s1572_s21 }
  0x57   : > { %v268_v40 = vcvt.s32.f32 %v244_v11  ;;  %v270_v41 = vcvt.s32.f32 %v246_v13  ;;  %v271_v42 = vmul.f32 1.5707964, %v267_v36  ;;  %v273_v45 = vmul.f32 1.5707964, %v269_v37 }
  0x58   : > { %v255_v22 = vmul.f32 -0.28782314, %v251_v18  ;;  %v256_v23 = vmul.f32 -0.28782314, %v252_v19  ;;  %v257_v24 = vmul.f32 -0.28782314, %v253_v20  ;;  %p1581_p5 = por %p1580_p3, %p1579_p11 }
  0x59   : > { %v258_v25 = vmul.f32 -0.28782314, %v254_v21  ;;  %v272_v49 = vmul.f32 1.5707964, %v268_v40  ;;  %v274_v50 = vmul.f32 1.5707964, %v270_v41 }
  0x5a   : > { %v259_v26 = vmul.f32 1.442695, %v255_v22  ;;  %v261_v27 = vmul.f32 1.442695, %v256_v23  ;;  %v263_v28 = vmul.f32 1.442695, %v257_v24  ;;  %p1582_p6 = pnand %p1581_p5, %p1575_p10 }
  0x5b   : > { %v265_v29 = vmul.f32 1.442695, %v258_v25  ;;  %v1703_v33 = vmov 2102212464   ;;  %v1704_v35 = vmov 920167782  }
  0x5c   : > { %1476 = vpow2.f32 %v259_v26 }
  0x5d   : > { %1478 = vpow2.f32 %v261_v27  ;;  %v1700_v27 = vmov 683565275  }
  0x5e   : > { %1480 = vpow2.f32 %v263_v28 }
  0x5f   : > { %1482 = vpow2.f32 %v265_v29  ;;  %v1701_v29 = vmov 2475754826  }
  0x69   : > { %v1477_v43 = vpop.eup %1476 }
  0x6a   : > { %v1479_v44 = vpop.eup %1478  ;;  %v286_v46 = vmul.f32 %v1477_v43, %v279_v38  ;;  %v287_v47 = vmul.f32 %v1477_v43, %v283_v39  ;;  %v1705_v43 = vmov 1326507024  }
  0x6b   : > { %v1481_v48 = vpop.eup %1480  ;;  %v288_v51 = vmul.f32 %v1479_v44, %v279_v38  ;;  %v289_v10 = vmul.f32 %v1479_v44, %v283_v39 }
  0x6c   : > { %v1483_v52 = vpop.eup %1482  ;;  %v290_v53 = vmul.f32 %v1481_v48, %v279_v38  ;;  %v291_v54 = vmul.f32 %v1481_v48, %v283_v39  ;;  %v1888_v55 = vadd.f32 %v286_v46, %v271_v42  ;;  %v1890_v58 = vadd.f32 %v287_v47, %v271_v42 }
  0x6d   : > { %v292_v56 = vmul.f32 %v1483_v52, %v279_v38  ;;  %v293_v57 = vmul.f32 %v1483_v52, %v283_v39  ;;  %v1897_v62 = vadd.f32 %v288_v51, %v272_v49  ;;  %v1911_v19 = vadd.f32 %v289_v10, %v272_v49 }
  0x6e   : > { %v1892_v59 = vadd.f32 %v290_v53, %v273_v45  ;;  %v1894_v60 = vadd.f32 %v291_v54, %v273_v45  ;;  %v302_v61 = vand.u32 2147483647, %v1888_v55  ;;  %v305_v1 = vand.u32 2139095040, %v1888_v55 }
  0x6f   : > { %v1899_v63 = vadd.f32 %v292_v56, %v274_v50  ;;  %v1901_v0 = vadd.f32 %v293_v57, %v274_v50  ;;  %v406_v2 = vand.u32 2147483647, %v1890_v58  ;;  %v409_v4 = vand.u32 2139095040, %v1890_v58 }
  0x70   : > { %v306_v3 = vshrl.u32 %v305_v1, 23  ;;  %v309_v5 = vand.u32 8388607, %v302_v61  ;;  %v513_v9 = vand.u32 2139095040, %v1897_v62  ;;  %v510_v24 = vand.u32 2147483647, %v1897_v62 }
  0x71   : > { %v413_v6 = vand.u32 8388607, %v406_v2  ;;  %v410_v8 = vshrl.u32 %v409_v4, 23  ;;  %vm304_vm14 = vcmp.lt.s32.totalorder %v1888_v55, 0  ;;  %vm2025_vm0 = vcmp.le.f32.partialorder %v302_v61, 0.7853982 }
  0x72   : > { %v1287_v7 = vadd.s32 4294967169, %v306_v3  ;;  %v514_v13 = vshrl.u32 %v513_v9, 23  ;;  %v310_v14 = vor.u32 8388608, %v309_v5 }
  0x73   : > { %v1291_v12 = vadd.s32 4294967169, %v410_v8  ;;  %v414_v15 = vor.u32 8388608, %v413_v6 }
  0x74   : > { %v312_v11 = vadd.s32 1, %v1287_v7  ;;  %v1295_v17 = vadd.s32 4294967169, %v514_v13  ;;  %v1913_v22 = vshll.u32 %v310_v14, 8 }
  0x75   : > { %v416_v16 = vadd.s32 1, %v1291_v12  ;;  %v1915_v23 = vshll.u32 %v414_v15, 8 }
  0x76   : > { %vm313_vm1 = vcmp.gt.s32.totalorder %v312_v11, 0  ;;  %v1918_v25 = vadd.s32 1, %v1295_v17 }
  0x77   : > { %v314_v18 = vsel %vm313_vm1, %v312_v11, 0  ;;  %vm417_vm2 = vcmp.gt.s32.totalorder %v416_v16, 0 }
  0x78   : > { %v315_v20 = vshrl.u32 %v314_v18, 5  ;;  %v316_v21 = vand.u32 31, %v314_v18  ;;  %v418_v37 = vsel %vm417_vm2, %v416_v16, 0  ;;  %vm521_vm9 = vcmp.gt.s32.totalorder %v1918_v25, 0 }
  0x79   : > { %v419_v50 = vshrl.u32 %v418_v37, 5  ;;  %v420_v51 = vand.u32 31, %v418_v37 }
  0x7a   : > { %v317_v26 = vsub.s32 32, %v316_v21  ;;  %v319_v28 = vshll.u32 %v1700_v27, %v316_v21  ;;  %v322_v30 = vshll.u32 %v1701_v29, %v316_v21  ;;  %v325_v32 = vshll.u32 %v1702_v31, %v316_v21 }
  0x7b   : > { %v328_v34 = vshll.u32 %v1703_v33, %v316_v21  ;;  %v331_v36 = vshll.u32 %v1704_v35, %v316_v21  ;;  %vm334_vm3 = vcmp.lt.s32.totalorder %v315_v20, 1  ;;  %vm335_vm4 = vcmp.lt.s32.totalorder %v315_v20, 2 }
  0x7c   : > { %v318_v38 = vshrl.u32 %v1700_v27, %v317_v26  ;;  %v320_v39 = vshrl.u32 %v1701_v29, %v317_v26  ;;  %v323_v40 = vshrl.u32 %v1702_v31, %v317_v26  ;;  %v326_v41 = vshrl.u32 %v1703_v33, %v317_v26 }
  0x7d   : > { %v329_v42 = vshrl.u32 %v1704_v35, %v317_v26  ;;  %v332_v44 = vshrl.u32 %v1705_v43, %v317_v26  ;;  %vm336_vm5 = vcmp.lt.s32.totalorder %v315_v20, 3  ;;  %vm337_vm6 = vcmp.lt.s32.totalorder %v315_v20, 4 }
  0x7e   : > { %v321_v45 = vor.u32 %v320_v39, %v319_v28  ;;  %v324_v46 = vor.u32 %v323_v40, %v322_v30  ;;  %v327_v47 = vor.u32 %v326_v41, %v325_v32  ;;  %v421_v4 = vsub.s32 32, %v420_v51 }
  0x7f   : > { %v330_v48 = vor.u32 %v329_v42, %v328_v34  ;;  %v333_v49 = vor.u32 %v332_v44, %v331_v36  ;;  %v423_v8 = vshll.u32 %v1700_v27, %v420_v51  ;;  %v426_v18 = vshll.u32 %v1701_v29, %v420_v51 }
  0x80   : > { %v338_v52 = vsel %vm334_vm3, %v318_v38, %v321_v45  ;;  %v339_v53 = vsel %vm337_vm6, %v327_v47, 2102212464  ;;  %v342_v54 = vsel %vm334_vm3, %v321_v45, %v324_v46  ;;  %v346_v56 = vsel %vm334_vm3, %v324_v46, %v327_v47 }
  0x81   : > { %v340_v57 = vsel %vm336_vm5, %v324_v46, %v339_v53  ;;  %v343_v1 = vsel %vm337_vm6, %v330_v48, 920167782  ;;  %v347_v3 = vsel %vm337_vm6, %v333_v49, 1326507024  ;;  %v422_v12 = vshrl.u32 %v1700_v27, %v421_v4 }
  0x82   : > { %v341_v5 = vsel %vm335_vm4, %v338_v52, %v340_v57  ;;  %v344_v6 = vsel %vm336_vm5, %v327_v47, %v343_v1  ;;  %v348_v7 = vsel %vm336_vm5, %v330_v48, %v347_v3  ;;  %v424_v17 = vshrl.u32 %v1701_v29, %v421_v4 }
  0x83   : > { %v345_v9 = vsel %vm335_vm4, %v342_v54, %v344_v6  ;;  %v349_v10 = vsel %vm335_vm4, %v346_v56, %v348_v7  ;;  %v357_v11 = vmul.u32 %v1913_v22, %v341_v5  ;;  %v427_v20 = vshrl.u32 %v1702_v31, %v421_v4 }
  0x84   : > { %v1945_v13 = vmul.u32.u64.low %v1913_v22, %v349_v10  ;;  %v1946_v14 = vmul.u32.u64.high %v1913_v22, %v349_v10, %v1945_v13  ;;  %v1949_v15 = vmul.u32.u64.low %v1913_v22, %v345_v9  ;;  %v1950_v16 = vmul.u32.u64.high %v1913_v22, %v345_v9, %v1949_v15 }
  0x85   : > { %v429_v21 = vshll.u32 %v1702_v31, %v420_v51  ;;  %v430_v26 = vshrl.u32 %v1703_v33, %v421_v4  ;;  %v432_v28 = vshll.u32 %v1703_v33, %v420_v51  ;;  %v433_v30 = vshrl.u32 %v1704_v35, %v421_v4 }
  0x86   : > { %v435_v32 = vshll.u32 %v1704_v35, %v420_v51  ;;  %v425_v34 = vor.u32 %v424_v17, %v423_v8  ;;  %v428_v22 = vor.u32 %v427_v20, %v426_v18  ;;  %v436_v36 = vshrl.u32 %v1705_v43, %v421_v4 }
  0x87   : > { %vm438_vm7 = vcmp.lt.s32.totalorder %v419_v50, 1  ;;  %vm359_vm8 = vc.u32 %v1946_v14, %v1949_v15  ;;  %v360_v37 = vadd.s32 1, %v1950_v16  ;;  %v431_v38 = vor.u32 %v430_v26, %v429_v21 }
  0x88   : > { %v434_v39 = vor.u32 %v433_v30, %v432_v28  ;;  %v437_v40 = vor.u32 %v436_v36, %v435_v32  ;;  %vm439_vm10 = vcmp.lt.s32.totalorder %v419_v50, 2  ;;  %vm440_vm11 = vcmp.lt.s32.totalorder %v419_v50, 3 }
  0x89   : > { %v361_v41 = vsel %vm359_vm8, %v360_v37, %v1950_v16  ;;  %vm441_vm12 = vcmp.lt.s32.totalorder %v419_v50, 4  ;;  %v442_v42 = vsel %vm438_vm7, %v422_v12, %v425_v34  ;;  %v446_v44 = vsel %vm438_vm7, %v425_v34, %v428_v22 }
  0x8a   : > { %v362_v45 = vadd.s32 %v361_v41, %v357_v11  ;;  %v443_v46 = vsel %vm441_vm12, %v431_v38, 2102212464  ;;  %v447_v47 = vsel %vm441_vm12, %v434_v39, 920167782  ;;  %v450_v48 = vsel %vm438_vm7, %v428_v22, %v431_v38 }
  0x8b   : > { %v444_v49 = vsel %vm440_vm11, %v428_v22, %v443_v46  ;;  %v448_v51 = vsel %vm440_vm11, %v431_v38, %v447_v47  ;;  %v451_v52 = vsel %vm441_vm12, %v437_v40, 1326507024  ;;  %v517_v53 = vand.u32 8388607, %v510_v24 }
  0x8c   : > { %v363_v54 = vadd.s32 536870912, %v362_v45  ;;  %v449_v56 = vsel %vm439_vm10, %v446_v44, %v448_v51  ;;  %v452_v57 = vsel %vm440_vm11, %v434_v39, %v451_v52  ;;  %v522_v1 = vsel %vm521_vm9, %v1918_v25, 0 }
  0x8d   : > { %v445_v3 = vsel %vm439_vm10, %v442_v42, %v444_v49  ;;  %v453_v4 = vsel %vm439_vm10, %v450_v48, %v452_v57  ;;  %v1979_v5 = vmul.u32.u64.low %v1915_v23, %v449_v56  ;;  %v1980_v6 = vmul.u32.u64.high %v1915_v23, %v449_v56, %v1979_v5 }
  0x8e   : > { %v1983_v7 = vshrl.u32 %v363_v54, 30  ;;  %v1986_v8 = vmul.u32.u64.low %v1915_v23, %v453_v4  ;;  %v1987_v9 = vmul.u32.u64.high %v1915_v23, %v453_v4, %v1986_v8  ;;  %v617_v10 = vand.u32 2139095040, %v1911_v19 }
  0x8f   : > { %v524_v11 = vand.u32 31, %v522_v1  ;;  %v614_v25 = vand.u32 2147483647, %v1911_v19  ;;  %v461_v50 = vmul.u32 %v1915_v23, %v445_v3  ;;  %v464_v13 = vadd.s32 1, %v1980_v6 }
  0x90   : > { %v365_v12 = vshll.u32 %v1983_v7, 30  ;;  %vm463_vm13 = vc.u32 %v1987_v9, %v1979_v5  ;;  %v518_v18 = vor.u32 8388608, %v517_v53  ;;  %v618_v20 = vshrl.u32 %v617_v10, 23 }
  0x91   : > { %v525_v16 = vsub.s32 32, %v524_v11  ;;  %v465_v21 = vsel %vm463_vm13, %v464_v13, %v1980_v6  ;;  %v527_v26 = vshll.u32 %v1700_v27, %v524_v11  ;;  %v530_v28 = vshll.u32 %v1701_v29, %v524_v11 }
  0x92   : > { %v1994_v17 = vsub.s32 %v362_v45, %v365_v12  ;;  %v2003_v30 = vand.u32 8388607, %v614_v25  ;;  %v466_v32 = vadd.s32 %v465_v21, %v461_v50  ;;  %v523_v36 = vshrl.u32 %v522_v1, 5 }
  0x93   : > { %v528_v34 = vshrl.u32 %v1701_v29, %v525_v16  ;;  %v531_v22 = vshrl.u32 %v1702_v31, %v525_v16  ;;  %v533_v37 = vshll.u32 %v1702_v31, %v524_v11  ;;  %v534_v38 = vshrl.u32 %v1703_v33, %v525_v16 }
  0x94   : > { %v368_v23 = vsub.s32 0, %v1994_v17  ;;  %v536_v39 = vshll.u32 %v1703_v33, %v524_v11  ;;  %v467_v41 = vadd.s32 536870912, %v466_v32  ;;  %v2013_v42 = vshll.u32 %v518_v18, 8 }
  0x95   : > { %v1299_v44 = vadd.s32 4294967169, %v618_v20  ;;  %v537_v45 = vshrl.u32 %v1704_v35, %v525_v16  ;;  %v539_v46 = vshll.u32 %v1704_v35, %v524_v11  ;;  %v540_v47 = vshrl.u32 %v1705_v43, %v525_v16 }
  0x96   : > { %v1288_v40 = vmin.u32 %v368_v23, %v1994_v17  ;;  %v622_v48 = vor.u32 8388608, %v2003_v30  ;;  %v358_v49 = vadd.s32 %v1949_v15, %v1946_v14  ;;  %v529_v52 = vor.u32 %v528_v34, %v527_v26 }
  0x97   : > { %v532_v53 = vor.u32 %v531_v22, %v530_v28  ;;  %v2021_v54 = vshrl.u32 %v467_v41, 30  ;;  %v535_v56 = vor.u32 %v534_v38, %v533_v37  ;;  %v538_v57 = vor.u32 %v537_v45, %v536_v39 }
  0x98   : > { %v370_v51 = vclz %v1288_v40  ;;  %vm542_vm15 = vcmp.lt.s32.totalorder %v523_v36, 1  ;;  %v388_v4 = vsub.s32 4, %v1983_v7  ;;  %vm544_vm1 = vcmp.lt.s32.totalorder %v523_v36, 3 }
  0x99   : > { %vm545_vm2 = vcmp.lt.s32.totalorder %v523_v36, 4  ;;  %v469_v14 = vshll.u32 %v2021_v54, 30  ;;  %v526_v15 = vshrl.u32 %v1700_v27, %v525_v16  ;;  %v541_v6 = vor.u32 %v540_v47, %v539_v46 }
  0x9a   : > { %v1289_v3 = vadd.s32 4294967294, %v370_v51  ;;  %v551_v8 = vsel %vm545_vm2, %v538_v57, 920167782  ;;  %vm543_vm4 = vcmp.lt.s32.totalorder %v523_v36, 2  ;;  %v550_v10 = vsel %vm542_vm15, %v529_v52, %v532_v53 }
  0x9b   : > { %v624_v61 = vadd.s32 1, %v1299_v44  ;;  %v2034_v12 = vsub.s32 %v466_v32, %v469_v14  ;;  %v547_v50 = vsel %vm545_vm2, %v535_v56, 2102212464  ;;  %v552_v13 = vsel %vm544_vm1, %v535_v56, %v551_v8 }
  0x9c   : > { %vm1290_vm3 = vcmp.lt.s32.totalorder %v1289_v3, 0  ;;  %v554_v16 = vsel %vm542_vm15, %v532_v53, %v535_v56  ;;  %v389_v26 = vsel %vm304_vm14, %v388_v4, %v1983_v7  ;;  %v546_v30 = vsel %vm542_vm15, %v526_v15, %v529_v52 }
  0x9d   : > { %v373_v11 = vsel %vm1290_vm3, 0, %v1289_v3  ;;  %v472_v28 = vsub.s32 0, %v2034_v12  ;;  %v555_v23 = vsel %vm545_vm2, %v541_v6, 1326507024  ;;  %v548_v22 = vsel %vm544_vm1, %v532_v53, %v547_v50 }
  0x9e   : > { %v374_v18 = vsub.s32 32, %v373_v11  ;;  %v375_v20 = vshll.u32 %v1994_v17, %v373_v11  ;;  %v378_v21 = vsub.s32 4294967266, %v373_v11  ;;  %v556_v37 = vsel %vm544_vm1, %v538_v57, %v555_v23 }
  0x9f   : > { %v1292_v17 = vmin.u32 %v472_v28, %v2034_v12  ;;  %v553_v38 = vsel %vm543_vm4, %v550_v10, %v552_v13  ;;  %v557_v39 = vsel %vm543_vm4, %v554_v16, %v556_v37  ;;  %vm625_vm5 = vcmp.gt.s32.totalorder %v624_v61, 0 }
  0xa0   : > { %v376_v32 = vshrl.u32 %v358_v49, %v374_v18  ;;  %v379_v34 = vadd.s32 127, %v378_v21  ;;  %v2052_v41 = vmul.u32.u64.low %v2013_v42, %v557_v39  ;;  %v2053_v44 = vmul.u32.u64.high %v2013_v42, %v557_v39, %v2052_v41 }
  0xa1   : > { %v391_v45 = vsel %vm2025_vm0, 0, %v389_v26  ;;  %v474_v46 = vclz %v1292_v17  ;;  %v549_v47 = vsel %vm543_vm4, %v546_v30, %v548_v22  ;;  %vm408_vm6 = vcmp.lt.s32.totalorder %v1890_v58, 0 }
  0xa2   : > { %v377_v7 = vor.u32 %v376_v32, %v375_v20  ;;  %v380_v40 = vshll.u32 %v379_v34, 23  ;;  %v2059_v52 = vmul.u32.u64.low %v2013_v42, %v553_v38  ;;  %v2060_v53 = vmul.u32.u64.high %v2013_v42, %v553_v38, %v2059_v52 }
  0xa3   : > { %v1293_v56 = vadd.s32 4294967294, %v474_v46  ;;  %v626_v57 = vsel %vm625_vm5, %v624_v61, 0  ;;  %v2064_v3 = vshll.u32 %v622_v48, 8  ;;  %v395_v14 = vadd.s32 3, %v391_v45 }
  0xa4   : > { %v381_v49 = vor.u32 4788187, %v380_v40  ;;  %v384_v51 = vcvt.s32.f32 %v377_v7  ;;  %v462_v15 = vadd.s32 %v1979_v5, %v1987_v9  ;;  %v492_v36 = vsub.s32 4, %v2021_v54 }
  0xa5   : > { %vm2071_vm7 = vcmp.le.f32.partialorder %v406_v2, 0.7853982  ;;  %vm1294_vm8 = vcmp.lt.s32.totalorder %v1293_v56, 0  ;;  %v565_v8 = vmul.u32 %v2013_v42, %v549_v47  ;;  %vm567_vm9 = vc.u32 %v2053_v44, %v2059_v52 }
  0xa6   : > { %v382_v4 = vand.u32 2147483647, %v381_v49  ;;  %v628_v48 = vand.u32 31, %v626_v57  ;;  %v477_v61 = vsel %vm1294_vm8, 0, %v1293_v56  ;;  %v568_v11 = vadd.s32 1, %v2060_v53 }
  0xa7   : > { %v718_v5 = vand.u32 2147483647, %v1892_v59  ;;  %v478_v9 = vsub.s32 32, %v477_v61  ;;  %v479_v50 = vshll.u32 %v2034_v12, %v477_v61  ;;  %v482_v2 = vsub.s32 4294967266, %v477_v61 }
  0xa8   : > { %v385_v10 = vmul.f32 %v384_v51, %v382_v4  ;;  %v629_v13 = vsub.s32 32, %v628_v48  ;;  %v2081_v20 = vand.u32 3, %v395_v14  ;;  %v493_v42 = vsel %vm408_vm6, %v492_v36, %v2021_v54 }
  0xa9   : > { %v569_v21 = vsel %vm567_vm9, %v568_v11, %v2060_v53  ;;  %v480_v16 = vshrl.u32 %v462_v15, %v478_v9  ;;  %v483_v26 = vadd.s32 127, %v482_v2  ;;  %v2087_v30 = vshrl.u32 %v626_v57, 5 }
  0xaa   : > { %v386_v18 = vxor.u32 2147483648, %v385_v10  ;;  %v570_v28 = vadd.s32 %v569_v21, %v565_v8  ;;  %v631_v12 = vshll.u32 %v1700_v27, %v628_v48  ;;  %v632_v32 = vshrl.u32 %v1701_v29, %v629_v13 }
  0xab   : > { %v634_v34 = vshll.u32 %v1701_v29, %v628_v48  ;;  %v481_v22 = vor.u32 %v480_v16, %v479_v50  ;;  %v484_v37 = vshll.u32 %v483_v26, 23  ;;  %v635_v38 = vshrl.u32 %v1702_v31, %v629_v13 }
  0xac   : > { %v387_v23 = vsel %vm304_vm14, %v386_v18, %v385_v10  ;;  %v571_v17 = vadd.s32 536870912, %v570_v28  ;;  %v637_v39 = vshll.u32 %v1702_v31, %v628_v48  ;;  %v638_v7 = vshrl.u32 %v1703_v33, %v629_v13 }
  0xad   : > { %v390_v54 = vsel %vm2025_vm0, %v1888_v55, %v387_v23  ;;  %v485_v40 = vor.u32 4788187, %v484_v37  ;;  %v488_v41 = vcvt.s32.f32 %v481_v22  ;;  %v495_v46 = vsel %vm2071_vm7, 0, %v493_v42 }
  0xae   : > { %1484 = vcosq.f32 %v390_v54  ;;  %v2100_v45 = vshrl.u32 %v571_v17, 30  ;;  %v640_v1 = vshll.u32 %v1703_v33, %v628_v48  ;;  %v641_v47 = vshrl.u32 %v1704_v35, %v629_v13 }
  0xaf   : > { %1486 = vsinq.f32 %v390_v54  ;;  %v643_v49 = vshll.u32 %v1704_v35, %v628_v48  ;;  %v486_v51 = vand.u32 2147483647, %v485_v40  ;;  %v644_v56 = vshrl.u32 %v1705_v43, %v629_v13 }
  0xb0   : > { %v573_v53 = vshll.u32 %v2100_v45, 30  ;;  %vm646_vm10 = vcmp.lt.s32.totalorder %v2087_v30, 1  ;;  %v633_v57 = vor.u32 %v632_v32, %v631_v12  ;;  %v636_v4 = vor.u32 %v635_v38, %v634_v34 }
  0xb1   : > { %v639_v14 = vor.u32 %v638_v7, %v637_v39  ;;  %v642_v15 = vor.u32 %v641_v47, %v640_v1  ;;  %v489_v36 = vmul.f32 %v488_v41, %v486_v51  ;;  %v645_v10 = vor.u32 %v644_v56, %v643_v49 }
  0xb2   : > { %v2110_v8 = vsub.s32 %v570_v28, %v573_v53  ;;  %vm649_vm11 = vcmp.lt.s32.totalorder %v2087_v30, 4  ;;  %vm398_vm12 = vcmp.eq.s32.totalorder %v2081_v20, 0  ;;  %vm401_vm13 = vcmp.eq.s32.totalorder %v2081_v20, 2 }
  0xb3   : > { %v499_v48 = vadd.s32 3, %v495_v46  ;;  %vm512_vm14 = vcmp.lt.s32.totalorder %v1897_v62, 0  ;;  %v630_v61 = vshrl.u32 %v1700_v27, %v629_v13  ;;  %vm648_vm15 = vcmp.lt.s32.totalorder %v2087_v30, 3 }
  0xb4   : > { %vm397_vm0 = vcmp.lt.s32.totalorder %v2081_v20, 2  ;;  %v490_v11 = vxor.u32 2147483648, %v489_v36  ;;  %v576_v9 = vsub.s32 0, %v2110_v8  ;;  %v651_v50 = vsel %vm649_vm11, %v639_v14, 2102212464 }
  0xb5   : > { %v721_v2 = vand.u32 2139095040, %v1892_v59  ;;  %vm394_vm1 = vweird.f32 %v1888_v55  ;;  %vm647_vm2 = vcmp.lt.s32.totalorder %v2087_v30, 2  ;;  %v654_v13 = vsel %vm646_vm10, %v633_v57, %v636_v4 }
  0xb6   : > { %v655_v18 = vsel %vm649_vm11, %v642_v15, 920167782  ;;  %v659_v42 = vsel %vm649_vm11, %v645_v10, 1326507024  ;;  %v491_v21 = vsel %vm408_vm6, %v490_v11, %v489_v36  ;;  %v1296_v16 = vmin.u32 %v576_v9, %v2110_v8 }
  0xb7   : > { %v656_v26 = vsel %vm648_vm15, %v639_v14, %v655_v18  ;;  %v658_v28 = vsel %vm646_vm10, %v636_v4, %v639_v14  ;;  %v494_v23 = vsel %vm2071_vm7, %v1890_v58, %v491_v21  ;;  %v650_v12 = vsel %vm646_vm10, %v630_v61, %v633_v57 }
  0xb8   : > { %v652_v32 = vsel %vm648_vm15, %v636_v4, %v651_v50  ;;  %v660_v34 = vsel %vm648_vm15, %v642_v15, %v659_v42  ;;  %1488 = vcosq.f32 %v494_v23  ;;  %vm2150_vm3 = vcmp.le.f32.partialorder %v510_v24, 0.7853982 }
  0xb9   : > { %v578_v6 = vclz %v1296_v16  ;;  %v596_v22 = vsub.s32 4, %v2100_v45  ;;  %v657_v37 = vsel %vm647_vm2, %v654_v13, %v656_v26  ;;  %1490 = vsinq.f32 %v494_v23 }
  0xba   : > { %v566_v17 = vadd.s32 %v2059_v52, %v2053_v44  ;;  %v661_v38 = vsel %vm647_vm2, %v658_v28, %v660_v34  ;;  %v722_v39 = vshrl.u32 %v721_v2, 23  ;;  %v653_v24 = vsel %vm647_vm2, %v650_v12, %v652_v32 }
  0xbb   : > { %v1485_v7 = vpop.eup %1484  ;;  %v1297_v40 = vadd.s32 4294967294, %v578_v6  ;;  %v2164_v41 = vmul.u32.u64.low %v2064_v3, %v661_v38  ;;  %v2165_v46 = vmul.u32.u64.high %v2064_v3, %v661_v38, %v2164_v41  ;;  %v597_v30 = vsel %vm512_vm14, %v596_v22, %v2100_v45 }
  0xbc   : > { %v1487_v1 = vpop.eup %1486  ;;  %v402_v47 = vxor.u32 2147483648, %v1485_v7  ;;  %v2170_v49 = vmul.u32.u64.low %v2064_v3, %v657_v37  ;;  %v2171_v44 = vmul.u32.u64.high %v2064_v3, %v657_v37, %v2170_v49  ;;  %v1303_v52 = vadd.s32 4294967169, %v722_v39 }
  0xbd   : > { %v399_v51 = vxor.u32 2147483648, %v1487_v1  ;;  %vm1298_vm4 = vcmp.lt.s32.totalorder %v1297_v40, 0  ;;  %v725_v53 = vand.u32 8388607, %v718_v5  ;;  %v669_v4 = vmul.u32 %v2064_v3, %v653_v24 }
  0xbe   : > { %v403_v56 = vsel %vm401_vm13, %v402_v47, %v1487_v1  ;;  %v581_v57 = vsel %vm1298_vm4, 0, %v1297_v40  ;;  %v728_v14 = vadd.s32 1, %v1303_v52  ;;  %v500_v11 = vand.u32 3, %v499_v48 }
  0xbf   : > { %v400_v15 = vsel %vm398_vm12, %v1485_v7, %v399_v51  ;;  %v582_v36 = vsub.s32 32, %v581_v57  ;;  %v583_v10 = vshll.u32 %v2110_v8, %v581_v57  ;;  %v586_v61 = vsub.s32 4294967266, %v581_v57 }
  0xc0   : > { %v404_v45 = vsel %vm397_vm0, %v400_v15, %v403_v56  ;;  %vm671_vm5 = vc.u32 %v2165_v46, %v2170_v49  ;;  %v672_v9 = vadd.s32 1, %v2171_v44  ;;  %vm729_vm6 = vcmp.gt.s32.totalorder %v728_v14, 0 }
  0xc1   : > { %v405_v50 = vsel %vm394_vm1, nan, %v404_v45  ;;  %v584_v3 = vshrl.u32 %v566_v17, %v582_v36  ;;  %v587_v2 = vadd.s32 127, %v586_v61  ;;  %v599_v13 = vsel %vm2150_vm3, 0, %v597_v30 }
  0xc2   : > { %v673_v8 = vsel %vm671_vm5, %v672_v9, %v2171_v44  ;;  %v726_v18 = vor.u32 8388608, %v725_v53  ;;  %v730_v42 = vsel %vm729_vm6, %v728_v14, 0  ;;  %1134 = vst [vmem:[%s2193_s30] sm:$0xff] %v405_v50  ;;  %vm498_vm7 = vweird.f32 %v1890_v58 }
  0xc3   : > { %v585_v20 = vor.u32 %v584_v3, %v583_v10  ;;  %v588_v48 = vshll.u32 %v587_v2, 23  ;;  %v674_v55 = vadd.s32 %v673_v8, %v669_v4  ;;  %vm501_vm8 = vcmp.lt.s32.totalorder %v500_v11, 2 }
  0xc4   : > { %vm502_vm9 = vcmp.eq.s32.totalorder %v500_v11, 0  ;;  %vm505_vm10 = vcmp.eq.s32.totalorder %v500_v11, 2  ;;  %v732_v21 = vand.u32 31, %v730_v42  ;;  %v2197_v28 = vadd.s32 3, %v599_v13 }
  0xc5   : > { %v589_v16 = vor.u32 4788187, %v588_v48  ;;  %v592_v26 = vcvt.s32.f32 %v585_v20  ;;  %v675_v23 = vadd.s32 536870912, %v674_v55  ;;  %v1489_v12 = vpop.eup %1488  ;;  %v2200_v32 = vadd.s32 %v2170_v49, %v2165_v46 }
  0xc6   : > { %v733_v34 = vsub.s32 32, %v732_v21  ;;  %v2202_v6 = vshll.u32 %v726_v18, 8  ;;  %v822_v22 = vand.u32 2147483647, %v1894_v60  ;;  %v1491_v37 = vpop.eup %1490  ;;  %v506_v17 = vxor.u32 2147483648, %v1489_v12 }
  0xc7   : > { %v590_v38 = vand.u32 2147483647, %v589_v16  ;;  %v676_v39 = vshrl.u32 %v675_v23, 30  ;;  %v731_v7 = vshrl.u32 %v730_v42, 5  ;;  %v503_v40 = vxor.u32 2147483648, %v1491_v37 }
  0xc8   : > { %vm616_vm11 = vcmp.lt.s32.totalorder %v1911_v19, 0  ;;  %v735_v24 = vshll.u32 %v1700_v27, %v732_v21  ;;  %v736_v41 = vshrl.u32 %v1701_v29, %v733_v34  ;;  %v738_v46 = vshll.u32 %v1701_v29, %v732_v21 }
  0xc9   : > { %v507_v1 = vsel %vm505_vm10, %v506_v17, %v1491_v37  ;;  %v593_v47 = vmul.f32 %v592_v26, %v590_v38  ;;  %v677_v49 = vshll.u32 %v676_v39, 30  ;;  %v739_v44 = vshrl.u32 %v1702_v31, %v733_v34 }
  0xca   : > { %v504_v52 = vsel %vm502_vm9, %v1489_v12, %v503_v40  ;;  %v741_v51 = vshll.u32 %v1702_v31, %v732_v21  ;;  %v742_v30 = vshrl.u32 %v1703_v33, %v733_v34  ;;  %v744_v53 = vshll.u32 %v1703_v33, %v732_v21 }
  0xcb   : > { %v508_v56 = vsel %vm501_vm8, %v504_v52, %v507_v1  ;;  %v594_v57 = vxor.u32 2147483648, %v593_v47  ;;  %v678_v4 = vsub.s32 %v674_v55, %v677_v49  ;;  %v734_v14 = vshrl.u32 %v1700_v27, %v733_v34 }
  0xcc   : > { %v509_v15 = vsel %vm498_vm7, nan, %v508_v56  ;;  %v700_v36 = vsub.s32 4, %v676_v39  ;;  %v737_v10 = vor.u32 %v736_v41, %v735_v24  ;;  %v745_v61 = vshrl.u32 %v1704_v35, %v733_v34 }
  0xcd   : > { %v595_v45 = vsel %vm512_vm14, %v594_v57, %v593_v47  ;;  %vm2224_vm12 = vcmp.le.f32.partialorder %v614_v25, 0.7853982  ;;  %v680_v11 = vsub.s32 0, %v678_v4  ;;  %v740_v50 = vor.u32 %v739_v44, %v738_v46  ;;  %1135 = vst [vmem:[%s2193_s30 + $0x8] sm:$0xff] %v509_v15 }
  0xce   : > { %v747_v3 = vshll.u32 %v1704_v35, %v732_v21  ;;  %v598_v58 = vsel %vm2150_vm3, %v1897_v62, %v595_v45  ;;  %v743_v2 = vor.u32 %v742_v30, %v741_v51  ;;  %v746_v13 = vor.u32 %v745_v61, %v744_v53 }
  0xcf   : > { %v748_v8 = vshrl.u32 %v1705_v43, %v733_v34  ;;  %1492 = vcosq.f32 %v598_v58  ;;  %v1300_v18 = vmin.u32 %v680_v11, %v678_v4  ;;  %vm750_vm13 = vcmp.lt.s32.totalorder %v731_v7, 1 }
  0xd0   : > { %v825_v25 = vand.u32 2139095040, %v1894_v60  ;;  %1494 = vsinq.f32 %v598_v58  ;;  %vm752_vm14 = vcmp.lt.s32.totalorder %v731_v7, 3  ;;  %vm753_vm15 = vcmp.lt.s32.totalorder %v731_v7, 4 }
  0xd1   : > { %v749_v42 = vor.u32 %v748_v8, %v747_v3  ;;  %v682_v20 = vclz %v1300_v18  ;;  %v701_v48 = vsel %vm616_vm11, %v700_v36, %v676_v39  ;;  %vm751_vm0 = vcmp.lt.s32.totalorder %v731_v7, 2 }
  0xd2   : > { %v754_v54 = vsel %vm750_vm13, %v734_v14, %v737_v10  ;;  %v755_v55 = vsel %vm753_vm15, %v743_v2, 2102212464  ;;  %v758_v21 = vsel %vm750_vm13, %v737_v10, %v740_v50  ;;  %v759_v16 = vsel %vm753_vm15, %v746_v13, 920167782 }
  0xd3   : > { %v762_v26 = vsel %vm750_vm13, %v740_v50, %v743_v2  ;;  %v1301_v23 = vadd.s32 4294967294, %v682_v20  ;;  %v756_v12 = vsel %vm752_vm14, %v740_v50, %v755_v55  ;;  %v760_v34 = vsel %vm752_vm14, %v743_v2, %v759_v16 }
  0xd4   : > { %v763_v37 = vsel %vm753_vm15, %v749_v42, 1326507024  ;;  %v757_v17 = vsel %vm751_vm0, %v754_v54, %v756_v12  ;;  %v761_v38 = vsel %vm751_vm0, %v758_v21, %v760_v34  ;;  %v826_v24 = vshrl.u32 %v825_v25, 23 }
  0xd5   : > { %v764_v40 = vsel %vm752_vm14, %v746_v13, %v763_v37  ;;  %vm1302_vm1 = vcmp.lt.s32.totalorder %v1301_v23, 0  ;;  %v2241_v39 = vmul.u32.u64.low %v2202_v6, %v761_v38  ;;  %v2242_v46 = vmul.u32.u64.high %v2202_v6, %v761_v38, %v2241_v39 }
  0xd6   : > { %v765_v41 = vsel %vm751_vm0, %v762_v26, %v764_v40  ;;  %v685_v1 = vsel %vm1302_vm1, 0, %v1301_v23  ;;  %v703_v47 = vsel %vm2224_vm12, 0, %v701_v48  ;;  %v1307_v30 = vadd.s32 4294967169, %v826_v24 }
  0xd7   : > { %v2248_v49 = vmul.u32.u64.low %v2202_v6, %v765_v41  ;;  %v2249_v44 = vmul.u32.u64.high %v2202_v6, %v765_v41, %v2248_v49  ;;  %v686_v52 = vsub.s32 32, %v685_v1  ;;  %v687_v51 = vshll.u32 %v678_v4, %v685_v1 }
  0xd8   : > { %v690_v7 = vsub.s32 4294967266, %v685_v1  ;;  %v604_v53 = vand.u32 3, %v2197_v28  ;;  %v773_v56 = vmul.u32 %v2202_v6, %v757_v17  ;;  %v776_v15 = vadd.s32 1, %v2242_v46 }
  0xd9   : > { %v688_v57 = vshrl.u32 %v2200_v32, %v686_v52  ;;  %v832_v36 = vadd.s32 1, %v1307_v30  ;;  %v707_v10 = vadd.s32 3, %v703_v47  ;;  %vm775_vm2 = vc.u32 %v2249_v44, %v2241_v39 }
  0xda   : > { %v691_v14 = vadd.s32 127, %v690_v7  ;;  %v829_v61 = vand.u32 8388607, %v822_v22  ;;  %v777_v11 = vsel %vm775_vm2, %v776_v15, %v2242_v46  ;;  %vm602_vm4 = vweird.f32 %v1897_v62 }
  0xdb   : > { %v689_v4 = vor.u32 %v688_v57, %v687_v51  ;;  %vm833_vm3 = vcmp.gt.s32.totalorder %v832_v36, 0  ;;  %vm609_vm5 = vcmp.eq.s32.totalorder %v604_v53, 2  ;;  %v778_v32 = vadd.s32 %v777_v11, %v773_v56 }
  0xdc   : > { %v692_v45 = vshll.u32 %v691_v14, 23  ;;  %v1493_v28 = vpop.eup %1492  ;;  %v834_v6 = vsel %vm833_vm3, %v832_v36, 0  ;;  %vm606_vm6 = vcmp.eq.s32.totalorder %v604_v53, 0  ;;  %vm605_vm7 = vcmp.lt.s32.totalorder %v604_v53, 2 }
  0xdd   : > { %v1495_v50 = vpop.eup %1494  ;;  %v610_v3 = vxor.u32 2147483648, %v1493_v28  ;;  %v696_v2 = vcvt.s32.f32 %v689_v4  ;;  %v779_v8 = vadd.s32 536870912, %v778_v32  ;;  %v836_v18 = vand.u32 31, %v834_v6 }
  0xde   : > { %v693_v58 = vor.u32 4788187, %v692_v45  ;;  %v607_v13 = vxor.u32 2147483648, %v1495_v50  ;;  %v2261_v20 = vand.u32 3, %v707_v10  ;;  %v830_v48 = vor.u32 8388608, %v829_v61 }
  0xdf   : > { %v611_v25 = vsel %vm609_vm5, %v610_v3, %v1495_v50  ;;  %v2263_v55 = vshrl.u32 %v779_v8, 30  ;;  %v837_v21 = vsub.s32 32, %v836_v18  ;;  %v929_v16 = vand.u32 2139095040, %v1899_v63 }
  0xe0   : > { %v694_v42 = vand.u32 2147483647, %v693_v58  ;;  %v608_v54 = vsel %vm606_vm6, %v1493_v28, %v607_v13  ;;  %v835_v12 = vshrl.u32 %v834_v6, 5  ;;  %v839_v34 = vshll.u32 %v1700_v27, %v836_v18 }
  0xe1   : > { %v612_v26 = vsel %vm605_vm7, %v608_v54, %v611_v25  ;;  %v781_v17 = vshll.u32 %v2263_v55, 30  ;;  %v842_v38 = vshll.u32 %v1701_v29, %v836_v18  ;;  %v845_v40 = vshll.u32 %v1702_v31, %v836_v18 }
  0xe2   : > { %v697_v23 = vmul.f32 %v696_v2, %v694_v42  ;;  %v613_v37 = vsel %vm602_vm4, nan, %v612_v26  ;;  %v840_v41 = vshrl.u32 %v1701_v29, %v837_v21  ;;  %v843_v46 = vshrl.u32 %v1702_v31, %v837_v21 }
  0xe3   : > { %v846_v1 = vshrl.u32 %v1703_v33, %v837_v21  ;;  %1136 = vst [vmem:[%s2193_s30 + $0x10] sm:$0xff] %v613_v37  ;;  %v2276_v47 = vsub.s32 %v778_v32, %v781_v17  ;;  %v848_v49 = vshll.u32 %v1703_v33, %v836_v18  ;;  %v849_v62 = vshrl.u32 %v1704_v35, %v837_v21 }
  0xe4   : > { %v698_v24 = vxor.u32 2147483648, %v697_v23  ;;  %v930_v52 = vshrl.u32 %v929_v16, 23  ;;  %v838_v7 = vshrl.u32 %v1700_v27, %v837_v21  ;;  %v841_v30 = vor.u32 %v840_v41, %v839_v34 }
  0xe5   : > { %vm854_vm8 = vcmp.lt.s32.totalorder %v835_v12, 1  ;;  %v784_v56 = vsub.s32 0, %v2276_v47  ;;  %v844_v57 = vor.u32 %v843_v46, %v842_v38  ;;  %v847_v14 = vor.u32 %v846_v1, %v845_v40 }
  0xe6   : > { %v699_v51 = vsel %vm616_vm11, %v698_v24, %v697_v23  ;;  %v850_v15 = vor.u32 %v849_v62, %v848_v49  ;;  %v851_v36 = vshll.u32 %v1704_v35, %v836_v18  ;;  %v852_v10 = vshrl.u32 %v1705_v43, %v837_v21 }
  0xe7   : > { %v702_v53 = vsel %vm2224_vm12, %v1911_v19, %v699_v51  ;;  %v1304_v61 = vmin.u32 %v784_v56, %v2276_v47  ;;  %v870_v4 = vshll.u32 %v830_v48, 8  ;;  %v926_v45 = vand.u32 2147483647, %v1899_v63 }
  0xe8   : > { %1496 = vcosq.f32 %v702_v53  ;;  %v853_v11 = vor.u32 %v852_v10, %v851_v36  ;;  %vm856_vm9 = vcmp.lt.s32.totalorder %v835_v12, 3  ;;  %vm857_vm10 = vcmp.lt.s32.totalorder %v835_v12, 4 }
  0xe9   : > { %1498 = vsinq.f32 %v702_v53  ;;  %v1311_v9 = vadd.s32 4294967169, %v930_v52  ;;  %v786_v28 = vclz %v1304_v61  ;;  %vm855_vm11 = vcmp.lt.s32.totalorder %v835_v12, 2 }
  0xea   : > { %v858_v32 = vsel %vm854_vm8, %v838_v7, %v841_v30  ;;  %v862_v6 = vsel %vm854_vm8, %v841_v30, %v844_v57  ;;  %v859_v50 = vsel %vm857_vm10, %v847_v14, 2102212464  ;;  %v863_v3 = vsel %vm857_vm10, %v850_v15, 920167782 }
  0xeb   : > { %v866_v58 = vsel %vm854_vm8, %v844_v57, %v847_v14  ;;  %v867_v2 = vsel %vm857_vm10, %v853_v11, 1326507024  ;;  %v1305_v13 = vadd.s32 4294967294, %v786_v28  ;;  %v860_v8 = vsel %vm856_vm9, %v844_v57, %v859_v50 }
  0xec   : > { %v864_v18 = vsel %vm856_vm9, %v847_v14, %v863_v3  ;;  %v868_v25 = vsel %vm856_vm9, %v850_v15, %v867_v2  ;;  %v774_v42 = vadd.s32 %v2241_v39, %v2249_v44  ;;  %v804_v48 = vsub.s32 4, %v2263_v55 }
  0xed   : > { %v865_v54 = vsel %vm855_vm11, %v862_v6, %v864_v18  ;;  %v869_v21 = vsel %vm855_vm11, %v866_v58, %v868_v25  ;;  %vm1306_vm12 = vcmp.lt.s32.totalorder %v1305_v13, 0  ;;  %v861_v16 = vsel %vm855_vm11, %v858_v32, %v860_v8 }
  0xee   : > { %v2300_v26 = vmul.u32.u64.low %v870_v4, %v869_v21  ;;  %v2301_v23 = vmul.u32.u64.high %v870_v4, %v869_v21, %v2300_v26  ;;  %v789_v34 = vsel %vm1306_vm12, 0, %v1305_v13  ;;  %v936_v38 = vadd.s32 1, %v1311_v9 }
  0xef   : > { %v2303_v37 = vmul.u32.u64.low %v870_v4, %v865_v54  ;;  %v2304_v17 = vmul.u32.u64.high %v870_v4, %v865_v54, %v2303_v37  ;;  %vm720_vm13 = vcmp.lt.s32.totalorder %v1892_v59, 0  ;;  %v790_v39 = vsub.s32 32, %v789_v34 }
  0xf0   : > { %v791_v44 = vshll.u32 %v2276_v47, %v789_v34  ;;  %v794_v40 = vsub.s32 4294967266, %v789_v34  ;;  %vm706_vm14 = vweird.f32 %v1911_v19  ;;  %vm2312_vm15 = vcmp.le.f32.partialorder %v718_v5, 0.7853982 }
  0xf1   : > { %v2319_v24 = vsel %vm720_vm13, %v804_v48, %v2263_v55  ;;  %vm937_vm0 = vcmp.gt.s32.totalorder %v936_v38, 0  ;;  %v792_v41 = vshrl.u32 %v774_v42, %v790_v39  ;;  %v877_v1 = vmul.u32 %v870_v4, %v861_v16 }
  0xf2   : > { %v795_v46 = vadd.s32 127, %v794_v40  ;;  %vm879_vm1 = vc.u32 %v2301_v23, %v2303_v37  ;;  %vm709_vm2 = vcmp.lt.s32.totalorder %v2261_v20, 2  ;;  %v880_v47 = vadd.s32 1, %v2304_v17 }
  0xf3   : > { %v933_v5 = vand.u32 8388607, %v926_v45  ;;  %v938_v49 = vsel %vm937_vm0, %v936_v38, 0  ;;  %vm713_vm3 = vcmp.eq.s32.totalorder %v2261_v20, 2  ;;  %v793_v55 = vor.u32 %v792_v41, %v791_v44 }
  0xf4   : > { %v796_v52 = vshll.u32 %v795_v46, 23  ;;  %v940_v51 = vand.u32 31, %v938_v49  ;;  %vm710_vm4 = vcmp.eq.s32.totalorder %v2261_v20, 0  ;;  %v807_v53 = vsel %vm2312_vm15, 0, %v2319_v24 }
  0xf5   : > { %v1497_v62 = vpop.eup %1496  ;;  %v881_v56 = vsel %vm879_vm1, %v880_v47, %v2304_v17  ;;  %v800_v15 = vcvt.s32.f32 %v793_v55  ;;  %v934_v61 = vor.u32 8388608, %v933_v5  ;;  %v1033_v11 = vand.u32 2139095040, %v1901_v0 }
  0xf6   : > { %v1499_v7 = vpop.eup %1498  ;;  %v714_v30 = vxor.u32 2147483648, %v1497_v62  ;;  %v797_v14 = vor.u32 4788187, %v796_v52  ;;  %v882_v36 = vadd.s32 %v881_v56, %v877_v1  ;;  %v941_v4 = vsub.s32 32, %v940_v51 }
  0xf7   : > { %v711_v57 = vxor.u32 2147483648, %v1499_v7  ;;  %v939_v6 = vshrl.u32 %v938_v49, 5  ;;  %v943_v3 = vshll.u32 %v1700_v27, %v940_v51  ;;  %v946_v2 = vshll.u32 %v1701_v29, %v940_v51 }
  0xf8   : > { %v715_v10 = vsel %vm713_vm3, %v714_v30, %v1499_v7  ;;  %v798_v28 = vand.u32 2147483647, %v797_v14  ;;  %v883_v32 = vadd.s32 536870912, %v882_v36  ;;  %v944_v58 = vshrl.u32 %v1701_v29, %v941_v4 }
  0xf9   : > { %v712_v9 = vsel %vm710_vm4, %v1497_v62, %v711_v57  ;;  %v947_v25 = vshrl.u32 %v1702_v31, %v941_v4  ;;  %v949_v42 = vshll.u32 %v1702_v31, %v940_v51  ;;  %v950_v48 = vshrl.u32 %v1703_v33, %v941_v4 }
  0xfa   : > { %v716_v50 = vsel %vm709_vm2, %v712_v9, %v715_v10  ;;  %v801_v8 = vmul.f32 %v800_v15, %v798_v28  ;;  %v2341_v18 = vshrl.u32 %v883_v32, 30  ;;  %v952_v20 = vshll.u32 %v1703_v33, %v940_v51 }
  0xfb   : > { %v717_v13 = vsel %vm706_vm14, nan, %v716_v50  ;;  %v953_v54 = vshrl.u32 %v1704_v35, %v941_v4  ;;  %v2350_v26 = vshll.u32 %v934_v61, 8  ;;  %v1034_v19 = vshrl.u32 %v1033_v11, 23 }
  0xfc   : > { %1137 = vst [vmem:[%s2193_s30 + $0x18] sm:$0xff] %v717_v13  ;;  %v802_v21 = vxor.u32 2147483648, %v801_v8  ;;  %v885_v16 = vshll.u32 %v2341_v18, 30  ;;  %v942_v34 = vshrl.u32 %v1700_v27, %v941_v4  ;;  %v945_v17 = vor.u32 %v944_v58, %v943_v3 }
  0xfd   : > { %v955_v38 = vshll.u32 %v1704_v35, %v940_v51  ;;  %v956_v39 = vshrl.u32 %v1705_v43, %v941_v4  ;;  %v948_v24 = vor.u32 %v947_v25, %v946_v2  ;;  %v954_v41 = vor.u32 %v953_v54, %v952_v20 }
  0xfe   : > { %v803_v44 = vsel %vm720_vm13, %v802_v21, %v801_v8  ;;  %v2357_v40 = vsub.s32 %v882_v36, %v885_v16  ;;  %v951_v1 = vor.u32 %v950_v48, %v949_v42  ;;  %vm958_vm5 = vcmp.lt.s32.totalorder %v939_v6, 1 }
  0xff   : > { %v806_v46 = vsel %vm2312_vm15, %v1892_v59, %v803_v44  ;;  %v957_v47 = vor.u32 %v956_v39, %v955_v38  ;;  %vm960_vm6 = vcmp.lt.s32.totalorder %v939_v6, 3  ;;  %vm961_vm7 = vcmp.lt.s32.totalorder %v939_v6, 4 }
 0x100   : > { %1500 = vcosq.f32 %v806_v46  ;;  %v888_v5 = vsub.s32 0, %v2357_v40  ;;  %vm959_vm8 = vcmp.lt.s32.totalorder %v939_v6, 2  ;;  %v962_v49 = vsel %vm958_vm5, %v942_v34, %v945_v17 }
 0x101   : > { %1502 = vsinq.f32 %v806_v46  ;;  %v963_v62 = vsel %vm961_vm7, %v951_v1, 2102212464  ;;  %v966_v51 = vsel %vm958_vm5, %v945_v17, %v948_v24  ;;  %v967_v7 = vsel %vm961_vm7, %v954_v41, 920167782 }
 0x102   : > { %v1308_v55 = vmin.u32 %v888_v5, %v2357_v40  ;;  %v964_v52 = vsel %vm960_vm6, %v948_v24, %v963_v62  ;;  %v968_v12 = vsel %vm960_vm6, %v951_v1, %v967_v7  ;;  %v970_v30 = vsel %vm958_vm5, %v948_v24, %v951_v1 }
 0x103   : > { %v971_v56 = vsel %vm961_vm7, %v957_v47, 1326507024  ;;  %v811_v57 = vadd.s32 3, %v807_v53  ;;  %v965_v15 = vsel %vm959_vm8, %v962_v49, %v964_v52  ;;  %v969_v36 = vsel %vm959_vm8, %v966_v51, %v968_v12 }
 0x104   : > { %v890_v14 = vclz %v1308_v55  ;;  %v972_v10 = vsel %vm960_vm6, %v954_v41, %v971_v56  ;;  %v1315_v61 = vadd.s32 4294967169, %v1034_v19  ;;  %v878_v3 = vadd.s32 %v2303_v37, %v2301_v23 }
 0x105   : > { %v973_v11 = vsel %vm959_vm8, %v970_v30, %v972_v10  ;;  %v2371_v9 = vmul.u32.u64.low %v2350_v26, %v969_v36  ;;  %v2372_v28 = vmul.u32.u64.high %v2350_v26, %v969_v36, %v2371_v9  ;;  %v1030_v58 = vand.u32 2147483647, %v1901_v0 }
 0x106   : > { %v1309_v4 = vadd.s32 4294967294, %v890_v14  ;;  %v2376_v32 = vmul.u32.u64.low %v2350_v26, %v973_v11  ;;  %v2377_v50 = vmul.u32.u64.high %v2350_v26, %v973_v11, %v2376_v32  ;;  %v1040_v53 = vadd.s32 1, %v1315_v61 }
 0x107   : > { %v812_v2 = vand.u32 3, %v811_v57  ;;  %v981_v6 = vmul.u32 %v2350_v26, %v965_v15  ;;  %v984_v48 = vadd.s32 1, %v2372_v28  ;;  %vm810_vm11 = vweird.f32 %v1892_v59 }
 0x108   : > { %vm1310_vm9 = vcmp.lt.s32.totalorder %v1309_v4, 0  ;;  %vm1041_vm10 = vcmp.gt.s32.totalorder %v1040_v53, 0  ;;  %vm824_vm12 = vcmp.lt.s32.totalorder %v1894_v60, 0  ;;  %vm983_vm13 = vc.u32 %v2377_v50, %v2371_v9 }
 0x109   : > { %v893_v13 = vsel %vm1310_vm9, 0, %v1309_v4  ;;  %v1042_v23 = vsel %vm1041_vm10, %v1040_v53, 0  ;;  %v985_v54 = vsel %vm983_vm13, %v984_v48, %v2372_v28  ;;  %v1037_v21 = vand.u32 8388607, %v1030_v58 }
 0x10a   : > { %v894_v8 = vsub.s32 32, %v893_v13  ;;  %v895_v25 = vshll.u32 %v2357_v40, %v893_v13  ;;  %v898_v42 = vsub.s32 4294967266, %v893_v13  ;;  %vm813_vm14 = vcmp.lt.s32.totalorder %v812_v2, 2 }
 0x10b   : > { %vm817_vm15 = vcmp.eq.s32.totalorder %v812_v2, 2  ;;  %v986_v26 = vadd.s32 %v985_v54, %v981_v6  ;;  %v1044_v19 = vand.u32 31, %v1042_v23  ;;  %vm814_vm0 = vcmp.eq.s32.totalorder %v812_v2, 0 }
 0x10c   : > { %v896_v37 = vshrl.u32 %v878_v3, %v894_v8  ;;  %v899_v20 = vadd.s32 127, %v898_v42  ;;  %vm2394_vm1 = vcmp.le.f32.partialorder %v822_v22, 0.7853982  ;;  %v908_v24 = vsub.s32 4, %v2341_v18 }
 0x10d   : > { %v1501_v16 = vpop.eup %1500  ;;  %v987_v41 = vadd.s32 536870912, %v986_v26  ;;  %v1045_v46 = vsub.s32 32, %v1044_v19  ;;  %v1038_v49 = vor.u32 8388608, %v1037_v21  ;;  %v1047_v22 = vshll.u32 %v1700_v27, %v1044_v19 }
 0x10e   : > { %v1503_v34 = vpop.eup %1502  ;;  %v818_v17 = vxor.u32 2147483648, %v1501_v16  ;;  %v897_v39 = vor.u32 %v896_v37, %v895_v25  ;;  %v900_v44 = vshll.u32 %v899_v20, 23  ;;  %v1050_v52 = vshll.u32 %v1701_v29, %v1044_v19 }
 0x10f   : > { %v815_v40 = vxor.u32 2147483648, %v1503_v34  ;;  %v2399_v55 = vshrl.u32 %v987_v41, 30  ;;  %v1048_v12 = vshrl.u32 %v1701_v29, %v1045_v46  ;;  %v1051_v30 = vshrl.u32 %v1702_v31, %v1045_v46 }
 0x110   : > { %v819_v1 = vsel %vm817_vm15, %v818_v17, %v1503_v34  ;;  %v901_v47 = vor.u32 4788187, %v900_v44  ;;  %v904_v5 = vcvt.s32.f32 %v897_v39  ;;  %v909_v57 = vsel %vm824_vm12, %v908_v24, %v2341_v18 }
 0x111   : > { %v816_v62 = vsel %vm814_vm0, %v1501_v16, %v815_v40  ;;  %v989_v14 = vshll.u32 %v2399_v55, 30  ;;  %v1043_v15 = vshrl.u32 %v1042_v23, 5  ;;  %v1053_v10 = vshll.u32 %v1702_v31, %v1044_v19 }
 0x112   : > { %v820_v51 = vsel %vm813_vm14, %v816_v62, %v819_v1  ;;  %v902_v7 = vand.u32 2147483647, %v901_v47  ;;  %v1054_v61 = vshrl.u32 %v1703_v33, %v1045_v46  ;;  %v1056_v4 = vshll.u32 %v1703_v33, %v1044_v19 }
 0x113   : > { %v821_v56 = vsel %vm810_vm11, nan, %v820_v51  ;;  %v990_v29 = vsub.s32 %v986_v26, %v989_v14  ;;  %v1057_v11 = vshrl.u32 %v1704_v35, %v1045_v46  ;;  %v1059_v59 = vshll.u32 %v1704_v35, %v1044_v19 }
 0x114   : > { %v905_v36 = vmul.f32 %v904_v5, %v902_v7  ;;  %1138 = vst [vmem:[%s2193_s30 + $0x20] sm:$0xff] %v821_v56  ;;  %v1078_v28 = vshll.u32 %v1038_v49, 8  ;;  %v1049_v53 = vor.u32 %v1048_v12, %v1047_v22  ;;  %v1052_v18 = vor.u32 %v1051_v30, %v1050_v52 }
 0x115   : > { %v1060_v3 = vshrl.u32 %v1705_v43, %v1045_v46  ;;  %v992_v2 = vsub.s32 0, %v990_v29  ;;  %v1046_v13 = vshrl.u32 %v1700_v27, %v1045_v46  ;;  %v1058_v31 = vor.u32 %v1057_v11, %v1056_v4 }
 0x116   : > { %v906_v32 = vxor.u32 2147483648, %v905_v36  ;;  %vm1062_vm2 = vcmp.lt.s32.totalorder %v1043_v15, 1  ;;  %v1055_v6 = vor.u32 %v1054_v61, %v1053_v10  ;;  %vm1063_vm3 = vcmp.lt.s32.totalorder %v1043_v15, 2 }
 0x117   : > { %vm1065_vm4 = vcmp.lt.s32.totalorder %v1043_v15, 4  ;;  %v1312_v8 = vmin.u32 %v992_v2, %v990_v29  ;;  %v1061_v25 = vor.u32 %v1060_v3, %v1059_v59  ;;  %vm1064_vm5 = vcmp.lt.s32.totalorder %v1043_v15, 3 }
 0x118   : > { %v907_v33 = vsel %vm824_vm12, %v906_v32, %v905_v36  ;;  %v1067_v43 = vsel %vm1065_vm4, %v1055_v6, 2102212464  ;;  %v1070_v27 = vsel %vm1062_vm2, %v1049_v53, %v1052_v18  ;;  %v1071_v42 = vsel %vm1065_vm4, %v1058_v31, 920167782 }
 0x119   : > { %v910_v35 = vsel %vm2394_vm1, %v1894_v60, %v907_v33  ;;  %v911_v48 = vsel %vm2394_vm1, 0, %v909_v57  ;;  %v994_v23 = vclz %v1312_v8  ;;  %v1066_v37 = vsel %vm1062_vm2, %v1046_v13, %v1049_v53 }
 0x11a   : > { %1504 = vcosq.f32 %v910_v35  ;;  %v1068_v20 = vsel %vm1064_vm5, %v1052_v18, %v1067_v43  ;;  %v1072_v54 = vsel %vm1064_vm5, %v1055_v6, %v1071_v42  ;;  %v1074_v21 = vsel %vm1062_vm2, %v1052_v18, %v1055_v6 }
 0x11b   : > { %1506 = vsinq.f32 %v910_v35  ;;  %v1313_v16 = vadd.s32 4294967294, %v994_v23  ;;  %v1073_v26 = vsel %vm1063_vm3, %v1070_v27, %v1072_v54  ;;  %v1075_v19 = vsel %vm1065_vm4, %v1061_v25, 1326507024 }
 0x11c   : > { %v915_v34 = vadd.s32 3, %v911_v48  ;;  %v1076_v17 = vsel %vm1064_vm5, %v1058_v31, %v1075_v19  ;;  %v2437_v38 = vmul.u32.u64.low %v1078_v28, %v1073_v26  ;;  %v2438_v39 = vmul.u32.u64.high %v1078_v28, %v1073_v26, %v2437_v38 }
 0x11d   : > { %v982_v44 = vadd.s32 %v2371_v9, %v2377_v50  ;;  %vm1314_vm6 = vcmp.lt.s32.totalorder %v1313_v16, 0  ;;  %v1069_v40 = vsel %vm1063_vm3, %v1066_v37, %v1068_v20  ;;  %v1077_v24 = vsel %vm1063_vm3, %v1074_v21, %v1076_v17 }
 0x11e   : > { %v997_v41 = vsel %vm1314_vm6, 0, %v1313_v16  ;;  %v2444_v46 = vmul.u32.u64.low %v1078_v28, %v1077_v24  ;;  %v2445_v1 = vmul.u32.u64.high %v1078_v28, %v1077_v24, %v2444_v46  ;;  %v1085_v62 = vmul.u32 %v1078_v28, %v1069_v40 }
 0x11f   : > { %v998_v47 = vsub.s32 32, %v997_v41  ;;  %v999_v5 = vshll.u32 %v990_v29, %v997_v41  ;;  %v1002_v49 = vsub.s32 4294967266, %v997_v41  ;;  %v1088_v22 = vadd.s32 1, %v2438_v39 }
 0x120   : > { %v916_v52 = vand.u32 3, %v915_v34  ;;  %vm1087_vm7 = vc.u32 %v2445_v1, %v2437_v38  ;;  %vm914_vm11 = vweird.f32 %v1894_v60  ;;  %vm928_vm12 = vcmp.lt.s32.totalorder %v1899_v63, 0 }
 0x121   : > { %v1000_v51 = vshrl.u32 %v982_v44, %v998_v47  ;;  %v1003_v7 = vadd.s32 127, %v1002_v49  ;;  %v1089_v12 = vsel %vm1087_vm7, %v1088_v22, %v2438_v39  ;;  %v1012_v53 = vsub.s32 4, %v2399_v55 }
 0x122   : > { %v1090_v30 = vadd.s32 %v1089_v12, %v1085_v62  ;;  %vm921_vm8 = vcmp.eq.s32.totalorder %v916_v52, 2  ;;  %vm918_vm9 = vcmp.eq.s32.totalorder %v916_v52, 0  ;;  %vm917_vm10 = vcmp.lt.s32.totalorder %v916_v52, 2 }
 0x123   : > { %v1001_v9 = vor.u32 %v1000_v51, %v999_v5  ;;  %v1004_v50 = vshll.u32 %v1003_v7, 23  ;;  %vm927_vm13 = vcmp.le.f32.partialorder %v926_v45, 0.7853982  ;;  %v1013_v60 = vsel %vm928_vm12, %v1012_v53, %v2399_v55 }
 0x124   : > { %v1091_v10 = vadd.s32 536870912, %v1090_v30  ;;  %v1015_v8 = vsel %vm927_vm13, 0, %v1013_v60  ;;  %v1086_v42 = vadd.s32 %v2437_v38, %v2445_v1  ;;  %vm1018_vm2 = vweird.f32 %v1899_v63 }
 0x125   : > { %v1005_v57 = vor.u32 4788187, %v1004_v50  ;;  %v1008_v14 = vcvt.s32.f32 %v1001_v9  ;;  %v1019_v43 = vadd.s32 3, %v1015_v8  ;;  %vm1032_vm3 = vcmp.lt.s32.totalorder %v1901_v0, 0 }
 0x126   : > { %v1092_v11 = vshrl.u32 %v1091_v10, 30  ;;  %vm1031_vm4 = vcmp.le.f32.partialorder %v1030_v58, 0.7853982 }
 0x127   : > { %v1505_v56 = vpop.eup %1504  ;;  %v1006_v4 = vand.u32 2147483647, %v1005_v57  ;;  %v1020_v48 = vand.u32 3, %v1019_v43 }
 0x128   : > { %v1507_v15 = vpop.eup %1506  ;;  %v922_v36 = vxor.u32 2147483648, %v1505_v56  ;;  %v1093_v18 = vshll.u32 %v1092_v11, 30  ;;  %v1116_v47 = vsub.s32 4, %v1092_v11 }
 0x129   : > { %v919_v61 = vxor.u32 2147483648, %v1507_v15  ;;  %v1009_v28 = vmul.f32 %v1008_v14, %v1006_v4  ;;  %vm1025_vm15 = vcmp.eq.s32.totalorder %v1020_v48, 2  ;;  %vm1022_vm0 = vcmp.eq.s32.totalorder %v1020_v48, 0 }
 0x12a   : > { %v923_v29 = vsel %vm921_vm8, %v922_v36, %v1507_v15  ;;  %v1094_v13 = vsub.s32 %v1090_v30, %v1093_v18  ;;  %vm1021_vm1 = vcmp.lt.s32.totalorder %v1020_v48, 2  ;;  %v1117_v62 = vsel %vm1032_vm3, %v1116_v47, %v1092_v11 }
 0x12b   : > { %v920_v59 = vsel %vm918_vm9, %v1505_v56, %v919_v61  ;;  %v1010_v2 = vxor.u32 2147483648, %v1009_v28  ;;  %v1119_v22 = vsel %vm1031_vm4, 0, %v1117_v62  ;;  %vm1122_vm8 = vweird.f32 %v1901_v0 }
 0x12c   : > { %v924_v32 = vsel %vm917_vm10, %v920_v59, %v923_v29  ;;  %v1096_v6 = vsub.s32 0, %v1094_v13  ;;  %v1123_v52 = vadd.s32 3, %v1119_v22 }
 0x12d   : > { %v925_v3 = vsel %vm914_vm11, nan, %v924_v32  ;;  %v1011_v31 = vsel %vm928_vm12, %v1010_v2, %v1009_v28 }
 0x12e   : > { %1139 = vst [vmem:[%s2193_s30 + $0x28] sm:$0xff] %v925_v3  ;;  %v1014_v33 = vsel %vm927_vm13, %v1899_v63, %v1011_v31  ;;  %v1316_v35 = vmin.u32 %v1096_v6, %v1094_v13  ;;  %v1124_v51 = vand.u32 3, %v1123_v52 }
 0x12f   : > { %1508 = vcosq.f32 %v1014_v33 }
 0x130   : > { %1510 = vsinq.f32 %v1014_v33  ;;  %v1098_v25 = vclz %v1316_v35  ;;  %vm1129_vm5 = vcmp.eq.s32.totalorder %v1124_v51, 2  ;;  %vm1126_vm6 = vcmp.eq.s32.totalorder %v1124_v51, 0 }
 0x131   : > { %vm1125_vm7 = vcmp.lt.s32.totalorder %v1124_v51, 2 }
 0x132   : > { %v1317_v27 = vadd.s32 4294967294, %v1098_v25 }
 0x134   : > { %vm1318_vm14 = vcmp.lt.s32.totalorder %v1317_v27, 0 }
 0x135   : > { %v1101_v45 = vsel %vm1318_vm14, 0, %v1317_v27 }
 0x136   : > { %v1102_v23 = vsub.s32 32, %v1101_v45  ;;  %v1103_v37 = vshll.u32 %v1094_v13, %v1101_v45  ;;  %v1106_v20 = vsub.s32 4294967266, %v1101_v45 }
 0x138   : > { %v1104_v54 = vshrl.u32 %v1086_v42, %v1102_v23  ;;  %v1107_v55 = vadd.s32 127, %v1106_v20 }
 0x13a   : > { %v1105_v16 = vor.u32 %v1104_v54, %v1103_v37  ;;  %v1108_v26 = vshll.u32 %v1107_v55, 23 }
 0x13c   : > { %v1509_v21 = vpop.eup %1508  ;;  %v1109_v39 = vor.u32 4788187, %v1108_v26  ;;  %v1112_v38 = vcvt.s32.f32 %v1105_v16 }
 0x13d   : > { %v1511_v19 = vpop.eup %1510  ;;  %v1026_v34 = vxor.u32 2147483648, %v1509_v21 }
 0x13e   : > { %v1023_v17 = vxor.u32 2147483648, %v1511_v19  ;;  %v1110_v24 = vand.u32 2147483647, %v1109_v39 }
 0x13f   : > { %v1027_v44 = vsel %vm1025_vm15, %v1026_v34, %v1511_v19 }
 0x140   : > { %v1024_v40 = vsel %vm1022_vm0, %v1509_v21, %v1023_v17  ;;  %v1113_v1 = vmul.f32 %v1112_v38, %v1110_v24 }
 0x141   : > { %v1028_v41 = vsel %vm1021_vm1, %v1024_v40, %v1027_v44 }
 0x142   : > { %v1029_v46 = vsel %vm1018_vm2, nan, %v1028_v41  ;;  %v1114_v5 = vxor.u32 2147483648, %v1113_v1 }
 0x143   : > { %1140 = vst [vmem:[%s2193_s30 + $0x30] sm:$0xff] %v1029_v46 }
 0x144   : > { %v1115_v49 = vsel %vm1032_vm3, %v1114_v5, %v1113_v1 }
 0x145   : > { %v1118_v63 = vsel %vm1031_vm4, %v1901_v0, %v1115_v49 }
 0x146   : > { %1512 = vcosq.f32 %v1118_v63 }
 0x147   : > { %1514 = vsinq.f32 %v1118_v63 }
 0x153   : > { %v1513_v7 = vpop.eup %1512 }
 0x154   : > { %v1515_v9 = vpop.eup %1514  ;;  %v1130_v58 = vxor.u32 2147483648, %v1513_v7 }
 0x155   : > { %v1127_v50 = vxor.u32 2147483648, %v1515_v9 }
 0x156   : > { %v1131_v12 = vsel %vm1129_vm5, %v1130_v58, %v1515_v9 }
 0x157   : > { %v1128_v30 = vsel %vm1126_vm6, %v1513_v7, %v1127_v50 }
 0x158   : > { %v1132_v56 = vsel %vm1125_vm7, %v1128_v30, %v1131_v12 }
 0x159   : > { %v1133_v57 = vsel %vm1122_vm8, nan, %v1132_v56 }
 0x15a   : > { %1141 = vst [vmem:[%s2193_s30 + $0x38] sm:$0xff] %v1133_v57 }
 0x15b   : > { %1585 = shalt.err (!%p1582_p6)
}
 0x15c   : > { %s1586_s25 = scalar_lea.hbm %s2472_s20, 1024  ;;  %s1590_s27 = scalar_lea.hbm %s2541_s2, 4096 }
 0x15d   : > { %p1587_p13 = scmp.ne.s32.totalorder %s2472_s20, %s1586_s25  ;;  %p1591_p8 = scmp.lt.s32.totalorder %s2472_s20, %s2541_s2 }
 0x15e   : > { %p1592_p7 = scmp.lt.s32.totalorder %s1590_s27, %s1586_s25 }
 0x15f   : > { %p1588_p0 = pnand %p1587_p13, %p1806_p12 }
 0x160   : > { %p1593_p1 = por %p1592_p7, %p1591_p8 }
 0x161   : > { %p1589_p4 = pneg %p1588_p0 }
 0x163   : > { %p1594_p9 = pnand %p1593_p1, %p1589_p4 }
 0x165   : > { %1597 = shalt.err (!%p1594_p9)
}
 0x166   : > { %s1707_s7 = smov 256   ;;  %s1708_s8 = smov 16  }
 0x167   : > { %1365 = dma.vmem_to_hbm [thread:$0]  (%p1806_p12), %s2474_s18, 1024, %s2472_s20, %s2479_s22, %s1707_s7, %s1707_s7, %s1708_s8  }
 0x168 PF: > { %p1379_p10 = scmp.ge.s32.totalorder %s1696_s19, 2  ;;  %s1174_s12 = sand.u32 1, %s1656_s9  }
 0x169   : > { %s1175_s15 = scalar_lea.sflag [#allocation4], %s1174_s12 }
 0x16a   : > { %p1375_p11 = pnand %p1379_p10, %p1819_p2 }
 0x16c   : > { %p1376_p3 = pneg %p1375_p11 }
 0x16e   : > { %1651 = dma.done.wait (%p1376_p3), %s1175_s15, 1024  }
 0x16f   : > { %1653 = vsyncadd (%p1376_p3), %s1175_s15, 4294966272  ;;  %s21_s19 = sadd.s32 1, %s1696_s19   ;;  %s2568_s16 = sld [smem:[#allocation11_spill]] }
 0x170   : > { %p18_p5 = scmp.ge.s32.totalorder %s21_s19, 6   ;;  %s2569_s3 = sld [smem:[#allocation12_spill]] }
 0x171   : > { %s2570_s18 = sld [smem:[#allocation13_spill]]  ;;  %s2571_s9 = smov %s1660_s10 }
 0x172   : > { %s2572_s10 = smov %s1664_s11  ;;  %s2573_s11 = smov %s1814_s5 }
 0x173   : > { %s2574_s12 = smov %s1672_s13  ;;  %s2575_s13 = smov %s1676_s14 }
 0x174   : > { %s2576_s14 = smov %s1811_s4  ;;  %s2577_s15 = smov %s1688_s17 }
 0x175   :  { %20 = sbr.rel (!%p18_p5) target bundleno = 13 (0xd), region = 86 }
 0x176   : > { %s2578_s17 = smov %s2569_s3 }
 0x17a   :  { %1180 = vsyncpa [#allocation3], 1 }
 0x17b   :  { %1182 = vsyncpa [#allocation3 + $0x1], 1 }
 0x17c   :  { %1183 = vsyncpa [#allocation6], 1 }
 0x17d   :  { %1185 = vsyncpa [#allocation6 + $0x1], 1 }
 0x17e   :  { %1186 = vsyncpa [#allocation4], 1 }
 0x17f   :  { %1188 = vsyncpa [#allocation4 + $0x1], 1 }

</bundles_post_ra>
